<compile_context>
chip_gen: v5e
topology: v5e:2x2
jax: 0.10.0
libtpu: 0.0.40
codegen_flags: <defaults>
</compile_context>

<pallas_src>
import functools

import jax
import jax.numpy as jnp
from jax.experimental import pallas as pl
from jax.experimental.pallas import tpu as pltpu


# --------------------------------------------------------------------------
# Stage 1: LayerNorm + fused projection GEMM + SiLU + OffsetScale,
#          emit v*gate, accumulate sim^T over the sequence, finalize row-sums.
# --------------------------------------------------------------------------
def _gau_stage1_kernel(x_ref, lnw_ref, lnb_ref, wf_ref, bf_ref, os_ref,
                       vg_ref, srow_ref, sim_acc,
                       *, hidden_dim, qk_dim, seq_len, eps):
    s_idx = pl.program_id(1)

    @pl.when(s_idx == 0)
    def _init():
        sim_acc[...] = jnp.zeros_like(sim_acc)

    x = x_ref[0]                                           # (TS, dim)

    # LayerNorm(dim), eps=1e-5, elementwise affine.
    mu = jnp.mean(x, axis=-1, keepdims=True)
    xc = x - mu
    var = jnp.mean(xc * xc, axis=-1, keepdims=True)
    xn = xc * jax.lax.rsqrt(var + eps)                     # rsqrt -> EUP slot
    xn = xn * lnw_ref[...] + lnb_ref[...]

    # One fused token GEMM: [W_hidden | W_qk] -> (TS, 2*hidden + qk_dim), then SiLU
    # (both to_hidden and to_qk are Linear + SiLU in the PyTorch module).
    proj = jnp.dot(xn, wf_ref[...], preferred_element_type=jnp.float32) + bf_ref[...]
    proj = proj * (1.0 / (1.0 + jnp.exp(-proj)))           # SiLU, exp on EUP

    v = proj[:, :hidden_dim]                               # 128-lane aligned slices
    gate = proj[:, hidden_dim:2 * hidden_dim]
    qk = proj[:, 2 * hidden_dim:]

    # OffsetScale (heads=2): rows of os = [gamma_q, beta_q, gamma_k, beta_k]
    q = qk * os_ref[0:1, :] + os_ref[1:2, :]
    k = qk * os_ref[2:3, :] + os_ref[3:4, :]

    vg_ref[0] = v * gate                                   # lane-dense (TS, hidden)

    # sim^T[D, d] += sum_i k[i, D] * q[i, d]   (accumulated transposed so the softmax
    # reductions and the broadcast in stage 2 stay lane-friendly).
    sim_acc[...] += jax.lax.dot_general(
        k, q, (((0,), (0,)), ((), ())), preferred_element_type=jnp.float32)

    @pl.when(s_idx == pl.num_programs(1) - 1)
    def _finalize():
        sim_t = sim_acc[...] * (1.0 / seq_len)             # softmax over D == axis 0
        m = jnp.max(sim_t, axis=0, keepdims=True)
        p = jnp.exp(sim_t - m)
        denom = jnp.sum(p, axis=0, keepdims=True)
        attn_t = p * pl.reciprocal(denom, approx=False)
        # row_sums[d] = sum_D softmax(sim)[d, D]  (the only quantity needed downstream
        # because the module's output einsum reduces attn over its last axis only).
        srow_ref[0] = jnp.sum(attn_t, axis=0, keepdims=True)   # (1, qk_dim)


# --------------------------------------------------------------------------
# Stage 2: out = (v*gate * row_sums) @ W_o + b_o + x   (token-parallel GEMM)
# --------------------------------------------------------------------------
def _gau_stage2_kernel(srow_ref, vg_ref, x_ref, wo_ref, bo_ref, o_ref):
    scale = srow_ref[0]                                    # (1, hidden) broadcast
    y = jnp.dot(vg_ref[0] * scale, wo_ref[...], preferred_element_type=jnp.float32)
    o_ref[0] = y + bo_ref[...] + x_ref[0]


# --------------------------------------------------------------------------
# Wrapper
# --------------------------------------------------------------------------
def gau_forward(x, params, *, seq_tile=256, eps=1e-5):
    """x: (B, S, dim) float32  ->  (B, S, dim) float32."""
    B, S, dim = x.shape
    hidden_dim = params["wo"].shape[0]
    fused_out = params["w_fused"].shape[1]
    qk_dim = fused_out - 2 * hidden_dim
    # The module's einsum '... d D, ... j d -> ... j d' requires hidden_dim == query_key_dim.
    assert hidden_dim == qk_dim, "GAU requires hidden_dim == query_key_dim"

    ts = min(seq_tile, S)
    assert S % ts == 0, "sequence length must be divisible by the seq tile"
    n_s = S // ts

    stage1 = functools.partial(_gau_stage1_kernel, hidden_dim=hidden_dim,
                               qk_dim=qk_dim, seq_len=S, eps=eps)
    vg, srow = pl.pallas_call(
        stage1,
        out_shape=(jax.ShapeDtypeStruct((B, S, hidden_dim), jnp.float32),
                   jax.ShapeDtypeStruct((B, 1, qk_dim), jnp.float32)),
        grid=(B, n_s),
        in_specs=[
            pl.BlockSpec((1, ts, dim), lambda b, s: (b, s, 0)),          # x tile
            pl.BlockSpec((1, dim), lambda b, s: (0, 0)),                 # ln weight
            pl.BlockSpec((1, dim), lambda b, s: (0, 0)),                 # ln bias
            pl.BlockSpec((dim, fused_out), lambda b, s: (0, 0)),         # [W_h | W_qk]
            pl.BlockSpec((1, fused_out), lambda b, s: (0, 0)),           # fused bias
            pl.BlockSpec((4, qk_dim), lambda b, s: (0, 0)),              # offsetscale
        ],
        out_specs=(
            pl.BlockSpec((1, ts, hidden_dim), lambda b, s: (b, s, 0)),   # v*gate
            pl.BlockSpec((1, 1, qk_dim), lambda b, s: (b, 0, 0)),        # softmax row sums
        ),
        scratch_shapes=[pltpu.VMEM((qk_dim, qk_dim), jnp.float32)],      # sim^T accumulator
        compiler_params=pltpu.CompilerParams(
            dimension_semantics=("parallel", "arbitrary")),
    )(x, params["ln_w"], params["ln_b"], params["w_fused"], params["b_fused"],
      params["os"])

    out = pl.pallas_call(
        _gau_stage2_kernel,
        out_shape=jax.ShapeDtypeStruct((B, S, dim), jnp.float32),
        grid=(B, n_s),
        in_specs=[
            pl.BlockSpec((1, 1, qk_dim), lambda b, s: (b, 0, 0)),        # row sums
            pl.BlockSpec((1, ts, hidden_dim), lambda b, s: (b, s, 0)),   # v*gate tile
            pl.BlockSpec((1, ts, dim), lambda b, s: (b, s, 0)),          # residual x tile
            pl.BlockSpec((hidden_dim, dim), lambda b, s: (0, 0)),        # W_o
            pl.BlockSpec((1, dim), lambda b, s: (0, 0)),                 # b_o
        ],
        out_specs=pl.BlockSpec((1, ts, dim), lambda b, s: (b, s, 0)),
        compiler_params=pltpu.CompilerParams(
            dimension_semantics=("parallel", "parallel")),
    )(srow, vg, x, params["wo"], params["bo"])
    return out


# --------------------------------------------------------------------------
# Pure-JAX reference (mirrors the PyTorch forward) and parameter init
# --------------------------------------------------------------------------
def gau_reference(x, params, *, eps=1e-5):
    hp = jax.lax.Precision.HIGHEST
    hidden_dim = params["wo"].shape[0]
    S = x.shape[1]
    mu = jnp.mean(x, -1, keepdims=True)
    var = jnp.mean((x - mu) ** 2, -1, keepdims=True)
    xn = (x - mu) / jnp.sqrt(var + eps) * params["ln_w"] + params["ln_b"]
    proj = jnp.einsum("bsd,df->bsf", xn, params["w_fused"], precision=hp) + params["b_fused"]
    proj = proj * (1.0 / (1.0 + jnp.exp(-proj)))           # SiLU
    v = proj[..., :hidden_dim]
    gate = proj[..., hidden_dim:2 * hidden_dim]
    qk = proj[..., 2 * hidden_dim:]
    q = qk * params["os"][0] + params["os"][1]
    k = qk * params["os"][2] + params["os"][3]
    sim = jnp.einsum("bid,biD->bdD", q, k, precision=hp) / S
    attn = jax.nn.softmax(sim, axis=-1)
    out = jnp.einsum("bdD,bjd->bjd", attn, v, precision=hp)
    out = out * gate
    out = jnp.einsum("bjh,hd->bjd", out, params["wo"], precision=hp) + params["bo"]
    return out + x


def init_params(key, dim, hidden_dim, qk_dim):
    ks = jax.random.split(key, 8)
    rnd = lambda k, shape, sc: jax.random.normal(k, shape, jnp.float32) * sc
    w_h = rnd(ks[0], (dim, 2 * hidden_dim), 0.05)          # to_hidden Linear weight (in, out)
    w_qk = rnd(ks[1], (dim, qk_dim), 0.05)                 # to_qk Linear weight (in, out)
    b_fused = jnp.concatenate([rnd(ks[2], (2 * hidden_dim,), 0.02),
                               rnd(ks[3], (qk_dim,), 0.02)]).reshape(1, -1)
    # OffsetScale: rows = [gamma_q, beta_q, gamma_k, beta_k]
    os_mat = jnp.stack([
        1.0 + rnd(ks[4], (qk_dim,), 0.02),
        rnd(ks[5], (qk_dim,), 0.02),
        1.0 + rnd(ks[6], (qk_dim,), 0.02),
        rnd(ks[7], (qk_dim,), 0.02),
    ], axis=0)
    return {
        "ln_w": jnp.ones((1, dim), jnp.float32),           # LayerNorm affine (PyTorch defaults)
        "ln_b": jnp.zeros((1, dim), jnp.float32),
        "w_fused": jnp.concatenate([w_h, w_qk], axis=1),   # (dim, 2*hidden + qk_dim)
        "b_fused": b_fused,                                # (1, 2*hidden + qk_dim)
        "os": os_mat,                                      # (4, qk_dim)
        "wo": rnd(jax.random.fold_in(key, 99), (hidden_dim, dim), 0.05),   # to_out Linear
        "bo": rnd(jax.random.fold_in(key, 100), (1, dim), 0.02),
    }


if __name__ == "__main__":
    key = jax.random.PRNGKey(0)
    B, S, dim = 2, 128, 64
    qk_dim = 128                       # GAU default query_key_dim
    hidden_dim = int(2.0 * dim)        # expansion_factor=2.0 -> 128 (== qk_dim, required)

    k_x, k_p = jax.random.split(key)
    x = jax.random.normal(k_x, (B, S, dim), jnp.float32)
    params = init_params(k_p, dim, hidden_dim, qk_dim)

    # seq_tile=64 -> 2 seq tiles per batch: exercises the cross-tile sim accumulation.
    out = gau_forward(x, params, seq_tile=64)
    out = jax.block_until_ready(out)

    assert out.shape == (B, S, dim)
    assert bool(jnp.all(jnp.isfinite(out)))
    ref = gau_reference(x, params)
    err = float(jnp.max(jnp.abs(out - ref)))
    assert err < 5e-3, f"max abs err vs reference: {err}"
    print("KERNEL_OK")
</pallas_src>

<mosaic_0001>
module attributes {stable_mosaic.version = 11 : i64} {
  func.func @_gau_stage1_kernel(%arg0: i32, %arg1: i32, %arg2: memref<1x64x64xf32, #tpu.memory_space<vmem>>, %arg3: memref<1x64xf32, #tpu.memory_space<vmem>>, %arg4: memref<1x64xf32, #tpu.memory_space<vmem>>, %arg5: memref<64x384xf32, #tpu.memory_space<vmem>>, %arg6: memref<1x384xf32, #tpu.memory_space<vmem>>, %arg7: memref<4x128xf32, #tpu.memory_space<vmem>>, %arg8: memref<1x64x128xf32, #tpu.memory_space<vmem>>, %arg9: memref<1x1x128xf32, #tpu.memory_space<vmem>>, %arg10: memref<128x128xf32, #tpu.memory_space<vmem>>) attributes {dimension_semantics = [#tpu.dimension_semantics<parallel>, #tpu.dimension_semantics<arbitrary>], iteration_bounds = array<i64: 2, 2>, scalar_prefetch = 0 : i64, scratch_operands = 1 : i64, tpu.core_type = #tpu.core_type<tc>, window_params = [{transform_indices = @transform_0, window_bounds = array<i64: 1, 64, 64>}, {pipeline_mode = #tpu.pipeline_mode<synchronous>, transform_indices = @transform_1, window_bounds = array<i64: 1, 64>}, {pipeline_mode = #tpu.pipeline_mode<synchronous>, transform_indices = @transform_2, window_bounds = array<i64: 1, 64>}, {pipeline_mode = #tpu.pipeline_mode<synchronous>, transform_indices = @transform_3, window_bounds = array<i64: 64, 384>}, {pipeline_mode = #tpu.pipeline_mode<synchronous>, transform_indices = @transform_4, window_bounds = array<i64: 1, 384>}, {pipeline_mode = #tpu.pipeline_mode<synchronous>, transform_indices = @transform_5, window_bounds = array<i64: 4, 128>}, {transform_indices = @transform_6, window_bounds = array<i64: 1, 64, 128>}, {transform_indices = @transform_7, window_bounds = array<i64: 1, 1, 128>}]} {
    %c0_i32 = arith.constant 0 : i32
    %0 = arith.cmpi eq, %arg1, %c0_i32 : i32
    %1 = arith.extui %0 : i1 to i32
    %c0_i32_0 = arith.constant 0 : i32
    %2 = arith.cmpi ne, %1, %c0_i32_0 : i32
    scf.if %2 {
      %cst_33 = arith.constant 0.000000e+00 : f32
      %66 = vector.broadcast %cst_33 : f32 to vector<128x128xf32>
      %c0_34 = arith.constant 0 : index
      %c0_35 = arith.constant 0 : index
      %67 = vector.load %arg10[%c0_34, %c0_35] : memref<128x128xf32, #tpu.memory_space<vmem>>, vector<128x128xf32>
      tpu.vector_store %arg10[%c0_34, %c0_35], %66 {strides = array<i32>} : memref<128x128xf32, #tpu.memory_space<vmem>>, vector<128x128xf32>,
    } else {
    }
    %c0 = arith.constant 0 : index
    %c0_1 = arith.constant 0 : index
    %c0_2 = arith.constant 0 : index
    %3 = vector.load %arg2[%c0, %c0_1, %c0_2] : memref<1x64x64xf32, #tpu.memory_space<vmem>>, vector<1x64x64xf32>
    %4 = vector.shape_cast %3 : vector<1x64x64xf32> to vector<64x64xf32>
    %cst = arith.constant dense<0.000000e+00> : vector<64xf32>
    %5 = vector.multi_reduction <add>, %4, %cst [1] : vector<64x64xf32> to vector<64xf32>
    %6 = vector.shape_cast %5 : vector<64xf32> to vector<64x1xf32>
    %cst_3 = arith.constant 6.400000e+01 : f32
    %7 = vector.broadcast %cst_3 : f32 to vector<64x1xf32>
    %8 = arith.divf %6, %7 : vector<64x1xf32>
    %9 = vector.broadcast %8 : vector<64x1xf32> to vector<64x64xf32>
    %10 = arith.subf %4, %9 : vector<64x64xf32>
    %11 = arith.mulf %10, %10 : vector<64x64xf32>
    %cst_4 = arith.constant dense<0.000000e+00> : vector<64xf32>
    %12 = vector.multi_reduction <add>, %11, %cst_4 [1] : vector<64x64xf32> to vector<64xf32>
    %13 = vector.shape_cast %12 : vector<64xf32> to vector<64x1xf32>
    %cst_5 = arith.constant 6.400000e+01 : f32
    %14 = vector.broadcast %cst_5 : f32 to vector<64x1xf32>
    %15 = arith.divf %13, %14 : vector<64x1xf32>
    %cst_6 = arith.constant 9.99999974E-6 : f32
    %16 = vector.broadcast %cst_6 : f32 to vector<64x1xf32>
    %17 = arith.addf %15, %16 : vector<64x1xf32>
    %18 = math.rsqrt %17 : vector<64x1xf32>
    %19 = vector.broadcast %18 : vector<64x1xf32> to vector<64x64xf32>
    %20 = arith.mulf %10, %19 : vector<64x64xf32>
    %c0_7 = arith.constant 0 : index
    %c0_8 = arith.constant 0 : index
    %21 = vector.load %arg3[%c0_7, %c0_8] : memref<1x64xf32, #tpu.memory_space<vmem>>, vector<1x64xf32>
    %22 = vector.broadcast %21 : vector<1x64xf32> to vector<64x64xf32>
    %23 = arith.mulf %20, %22 : vector<64x64xf32>
    %c0_9 = arith.constant 0 : index
    %c0_10 = arith.constant 0 : index
    %24 = vector.load %arg4[%c0_9, %c0_10] : memref<1x64xf32, #tpu.memory_space<vmem>>, vector<1x64xf32>
    %25 = vector.broadcast %24 : vector<1x64xf32> to vector<64x64xf32>
    %26 = arith.addf %23, %25 : vector<64x64xf32>
    %c0_11 = arith.constant 0 : index
    %c0_12 = arith.constant 0 : index
    %27 = vector.load %arg5[%c0_11, %c0_12] : memref<64x384xf32, #tpu.memory_space<vmem>>, vector<64x384xf32>
    %cst_13 = arith.constant dense<0.000000e+00> : vector<64x384xf32>
    %28 = tpu.matmul %26, %27, %cst_13 {dimension_numbers = #tpu.dot_dimension_numbers<[1], [0], [0], [1], [0, 0, 1, 1], [], []>} : vector<64x64xf32>, vector<64x384xf32>, vector<64x384xf32> -> vector<64x384xf32>
    %c0_14 = arith.constant 0 : index
    %c0_15 = arith.constant 0 : index
    %29 = vector.load %arg6[%c0_14, %c0_15] : memref<1x384xf32, #tpu.memory_space<vmem>>, vector<1x384xf32>
    %30 = vector.broadcast %29 : vector<1x384xf32> to vector<64x384xf32>
    %31 = arith.addf %28, %30 : vector<64x384xf32>
    %cst_16 = arith.constant 0.000000e+00 : f32
    %32 = vector.broadcast %cst_16 : f32 to vector<64x384xf32>
    %33 = arith.subf %32, %31 : vector<64x384xf32>
    %34 = math.exp %33 : vector<64x384xf32>
    %cst_17 = arith.constant 1.000000e+00 : f32
    %35 = vector.broadcast %cst_17 : f32 to vector<64x384xf32>
    %36 = arith.addf %35, %34 : vector<64x384xf32>
    %cst_18 = arith.constant 1.000000e+00 : f32
    %37 = vector.broadcast %cst_18 : f32 to vector<64x384xf32>
    %38 = arith.divf %37, %36 : vector<64x384xf32>
    %39 = arith.mulf %31, %38 : vector<64x384xf32>
    %40 = vector.extract_strided_slice %39 {offsets = [0, 0], sizes = [64, 128], strides = [1, 1]} : vector<64x384xf32> to vector<64x128xf32>
    %41 = vector.extract_strided_slice %39 {offsets = [0, 128], sizes = [64, 128], strides = [1, 1]} : vector<64x384xf32> to vector<64x128xf32>
    %42 = vector.extract_strided_slice %39 {offsets = [0, 256], sizes = [64, 128], strides = [1, 1]} : vector<64x384xf32> to vector<64x128xf32>
    %c0_19 = arith.constant 0 : index
    %c0_20 = arith.constant 0 : index
    %43 = vector.load %arg7[%c0_19, %c0_20] : memref<4x128xf32, #tpu.memory_space<vmem>>, vector<1x128xf32>
    %44 = vector.broadcast %43 : vector<1x128xf32> to vector<64x128xf32>
    %45 = arith.mulf %42, %44 : vector<64x128xf32>
    %c1 = arith.constant 1 : index
    %c0_21 = arith.constant 0 : index
    %46 = vector.load %arg7[%c1, %c0_21] : memref<4x128xf32, #tpu.memory_space<vmem>>, vector<1x128xf32>
    %47 = vector.broadcast %46 : vector<1x128xf32> to vector<64x128xf32>
    %48 = arith.addf %45, %47 : vector<64x128xf32>
    %c2 = arith.constant 2 : index
    %c0_22 = arith.constant 0 : index
    %49 = vector.load %arg7[%c2, %c0_22] : memref<4x128xf32, #tpu.memory_space<vmem>>, vector<1x128xf32>
    %50 = vector.broadcast %49 : vector<1x128xf32> to vector<64x128xf32>
    %51 = arith.mulf %42, %50 : vector<64x128xf32>
    %c3 = arith.constant 3 : index
    %c0_23 = arith.constant 0 : index
    %52 = vector.load %arg7[%c3, %c0_23] : memref<4x128xf32, #tpu.memory_space<vmem>>, vector<1x128xf32>
    %53 = vector.broadcast %52 : vector<1x128xf32> to vector<64x128xf32>
    %54 = arith.addf %51, %53 : vector<64x128xf32>
    %55 = arith.mulf %40, %41 : vector<64x128xf32>
    %c0_24 = arith.constant 0 : index
    %c0_25 = arith.constant 0 : index
    %c0_26 = arith.constant 0 : index
    %56 = vector.load %arg8[%c0_24, %c0_25, %c0_26] : memref<1x64x128xf32, #tpu.memory_space<vmem>>, vector<1x64x128xf32>
    %57 = vector.shape_cast %56 : vector<1x64x128xf32> to vector<64x128xf32>
    %58 = vector.shape_cast %55 : vector<64x128xf32> to vector<1x64x128xf32>
    tpu.vector_store %arg8[%c0_24, %c0_25, %c0_26], %58 {strides = array<i32>} : memref<1x64x128xf32, #tpu.memory_space<vmem>>, vector<1x64x128xf32>,
    %c0_27 = arith.constant 0 : index
    %c0_28 = arith.constant 0 : index
    %59 = vector.load %arg10[%c0_27, %c0_28] : memref<128x128xf32, #tpu.memory_space<vmem>>, vector<128x128xf32>
    %cst_29 = arith.constant dense<0.000000e+00> : vector<128x128xf32>
    %60 = tpu.matmul %54, %48, %cst_29 {dimension_numbers = #tpu.dot_dimension_numbers<[0], [0], [1], [1], [0, 1, 1, 1], [], []>} : vector<64x128xf32>, vector<64x128xf32>, vector<128x128xf32> -> vector<128x128xf32>
    %61 = arith.addf %59, %60 : vector<128x128xf32>
    %c0_30 = arith.constant 0 : index
    %c0_31 = arith.constant 0 : index
    %62 = vector.load %arg10[%c0_30, %c0_31] : memref<128x128xf32, #tpu.memory_space<vmem>>, vector<128x128xf32>
    tpu.vector_store %arg10[%c0_30, %c0_31], %61 {strides = array<i32>} : memref<128x128xf32, #tpu.memory_space<vmem>>, vector<128x128xf32>,
    %c1_i32 = arith.constant 1 : i32
    %63 = arith.cmpi eq, %arg1, %c1_i32 : i32
    %64 = arith.extui %63 : i1 to i32
    %c0_i32_32 = arith.constant 0 : i32
    %65 = arith.cmpi ne, %64, %c0_i32_32 : i32
    scf.if %65 {
      %c0_33 = arith.constant 0 : index
      %c0_34 = arith.constant 0 : index
      %66 = vector.load %arg10[%c0_33, %c0_34] : memref<128x128xf32, #tpu.memory_space<vmem>>, vector<128x128xf32>
      %cst_35 = arith.constant 7.812500e-03 : f32
      %67 = vector.broadcast %cst_35 : f32 to vector<128x128xf32>
      %68 = arith.mulf %66, %67 : vector<128x128xf32>
      %cst_36 = arith.constant dense<0xFF800000> : vector<128xf32>
      %69 = vector.multi_reduction <maximumf>, %68, %cst_36 [0] : vector<128x128xf32> to vector<128xf32>
      %70 = vector.shape_cast %69 : vector<128xf32> to vector<1x128xf32>
      %71 = vector.broadcast %70 : vector<1x128xf32> to vector<128x128xf32>
      %72 = arith.subf %68, %71 : vector<128x128xf32>
      %73 = math.exp %72 : vector<128x128xf32>
      %cst_37 = arith.constant dense<0.000000e+00> : vector<128xf32>
      %74 = vector.multi_reduction <add>, %73, %cst_37 [0] : vector<128x128xf32> to vector<128xf32>
      %75 = vector.shape_cast %74 : vector<128xf32> to vector<1x128xf32>
      %76 = tpu.reciprocal %75 : vector<1x128xf32> -> vector<1x128xf32>
      %77 = vector.broadcast %76 : vector<1x128xf32> to vector<128x128xf32>
      %78 = arith.mulf %73, %77 : vector<128x128xf32>
      %cst_38 = arith.constant dense<0.000000e+00> : vector<128xf32>
      %79 = vector.multi_reduction <add>, %78, %cst_38 [0] : vector<128x128xf32> to vector<128xf32>
      %80 = vector.shape_cast %79 : vector<128xf32> to vector<1x128xf32>
      %c0_39 = arith.constant 0 : index
      %c0_40 = arith.constant 0 : index
      %c0_41 = arith.constant 0 : index
      %81 = vector.load %arg9[%c0_39, %c0_40, %c0_41] : memref<1x1x128xf32, #tpu.memory_space<vmem>>, vector<1x1x128xf32>
      %82 = vector.shape_cast %81 : vector<1x1x128xf32> to vector<1x128xf32>
      %83 = vector.shape_cast %80 : vector<1x128xf32> to vector<1x1x128xf32>
      tpu.vector_store %arg9[%c0_39, %c0_40, %c0_41], %83 {strides = array<i32>} : memref<1x1x128xf32, #tpu.memory_space<vmem>>, vector<1x1x128xf32>,
    } else {
    }
    return
  }
  func.func @transform_0(%arg0: i32, %arg1: i32) -> (i32, i32, i32) {
    %c0_i32 = arith.constant 0 : i32
    %c0_i32_0 = arith.constant 0 : i32
    return %arg0, %arg1, %c0_i32 : i32, i32, i32
  }
  func.func @transform_1(%arg0: i32, %arg1: i32) -> (i32, i32) {
    %c0_i32 = arith.constant 0 : i32
    %c0_i32_0 = arith.constant 0 : i32
    %c0_i32_1 = arith.constant 0 : i32
    return %c0_i32, %c0_i32_0 : i32, i32
  }
  func.func @transform_2(%arg0: i32, %arg1: i32) -> (i32, i32) {
    %c0_i32 = arith.constant 0 : i32
    %c0_i32_0 = arith.constant 0 : i32
    %c0_i32_1 = arith.constant 0 : i32
    return %c0_i32, %c0_i32_0 : i32, i32
  }
  func.func @transform_3(%arg0: i32, %arg1: i32) -> (i32, i32) {
    %c0_i32 = arith.constant 0 : i32
    %c0_i32_0 = arith.constant 0 : i32
    %c0_i32_1 = arith.constant 0 : i32
    return %c0_i32, %c0_i32_0 : i32, i32
  }
  func.func @transform_4(%arg0: i32, %arg1: i32) -> (i32, i32) {
    %c0_i32 = arith.constant 0 : i32
    %c0_i32_0 = arith.constant 0 : i32
    %c0_i32_1 = arith.constant 0 : i32
    return %c0_i32, %c0_i32_0 : i32, i32
  }
  func.func @transform_5(%arg0: i32, %arg1: i32) -> (i32, i32) {
    %c0_i32 = arith.constant 0 : i32
    %c0_i32_0 = arith.constant 0 : i32
    %c0_i32_1 = arith.constant 0 : i32
    return %c0_i32, %c0_i32_0 : i32, i32
  }
  func.func @transform_6(%arg0: i32, %arg1: i32) -> (i32, i32, i32) {
    %c0_i32 = arith.constant 0 : i32
    %c0_i32_0 = arith.constant 0 : i32
    return %arg0, %arg1, %c0_i32 : i32, i32, i32
  }
  func.func @transform_7(%arg0: i32, %arg1: i32) -> (i32, i32, i32) {
    %c0_i32 = arith.constant 0 : i32
    %c0_i32_0 = arith.constant 0 : i32
    %c0_i32_1 = arith.constant 0 : i32
    return %arg0, %c0_i32, %c0_i32_0 : i32, i32, i32
  }
}

</mosaic_0001>

<bundles_post_ra>
// kernel: tpu_custom_call.1
= control target key start
LH: loop header
LB: loop body
LE: loop exit
PB: predicated region body
PF: predicated region fallthrough
CT: control target
= control target key end

     0   :  { %s3440_s0 = inlined_call_operand.vmem [shape: f32[2,128,64], index: 0, kind: input, shape index: {}]   ;;  %s3441_s1 = inlined_call_operand.vmem [shape: f32[1,64], index: 1, kind: input, shape index: {}]   ;;  %s3442_s2 = inlined_call_operand.vmem [shape: f32[1,64], index: 2, kind: input, shape index: {}]   ;;  %s3443_s3 = inlined_call_operand.vmem [shape: f32[64,384], index: 3, kind: input, shape index: {}]   ;;  %s3444_s4 = inlined_call_operand.vmem [shape: f32[1,384], index: 4, kind: input, shape index: {}]   ;;  %s3445_s5 = inlined_call_operand.vmem [shape: f32[4,128], index: 5, kind: input, shape index: {}]   ;;  %s3446_s6 = inlined_call_operand.hbm [shape: f32[2,128,128], index: 6, kind: output, shape index: {0}]   ;;  %s3447_s7 = inlined_call_operand.hbm [shape: f32[2,1,128], index: 7, kind: output, shape index: {1}]  }
   0x1   :  { %3457 = sst [smem:[#allocation18_spill]] %s3440_s0 }
   0x2   :  { %3458 = sst [smem:[#allocation19_spill]] %s3441_s1 }
   0x3   :  { %13 = vsyncpa [#allocation4], 0 }
   0x4   :  { %15 = vsyncpa [#allocation4 + $0x1], 0 }
   0x5   :  { %16 = vsyncpa [#allocation6], 0 }
   0x6   :  { %18 = vsyncpa [#allocation6 + $0x1], 0  ;;  %s2321_s24 = smov 0   ;;  %s2323_s25 = smov 0  }
   0x7   :  { %s2325_s26 = smov 0   ;;  %s2327_s27 = smov 0  }
   0x8   :  { %s2329_s28 = smov 0   ;;  %s2331_s29 = smov 0  }
   0x9   :  { %s2333_s30 = smov 0   ;;  %s2335_s8 = smov 0  }
   0xa   :  { %s2337_s9 = smov 0   ;;  %s2339_s10 = smov 0  }
   0xb   :  { %s2341_s11 = smov 0  }
   0xc LB: > { %3459 = sst [smem:[#allocation9_spill]] %s2243_s26  ;;  %s1785_s12 = sadd.s32 4294967295, %s2275_s11   ;;  %s2275_s11 = sphi %s2341_s11, %s24_s11   ;;  %s2271_s10 = sphi %s2339_s10, %s3512_s10   ;;  %s2267_s9 = sphi %s2337_s9, %s3511_s9   ;;  %s2263_s8 = sphi %s2335_s8, %s3510_s8   ;;  %s2259_s30 = sphi %s2333_s30, %s3509_s30   ;;  %s2255_s29 = sphi %s2331_s29, %s3517_s29   ;;  %s2251_s28 = sphi %s2329_s28, %s3516_s28   ;;  %s2247_s27 = sphi %s2327_s27, %s3515_s27   ;;  %s2243_s26 = sphi %s2325_s26, %s3506_s26   ;;  %s2239_s25 = sphi %s2323_s25, %s3514_s25   ;;  %s2235_s24 = sphi %s2321_s24, %s3513_s24  }
   0xd   : > { %3460 = sst [smem:[#allocation10_spill]] %s2247_s27  ;;  %s1786_s13 = sadd.s32 4294967294, %s2275_s11  }
   0xe   : > { %3461 = sst [smem:[#allocation11_spill]] %s2255_s29  ;;  %s33_s14 = sadd.s32 1, %s2267_s9 }
   0xf   : > { %3462 = sst [smem:[#allocation12_spill]] %s2267_s9  ;;  %s36_s15 = sadd.s32 1, %s2271_s10 }
  0x10   : > { %3463 = sst [smem:[#allocation13_spill]] %s2271_s10  ;;  %p34_p0 = scmp.ge.s32.totalorder %s33_s14, 2 }
  0x11   : > { %s178_s16 = sadd.s32 1, %s2255_s29  ;;  %p188_p1 = scmp.ne.s32.totalorder %s2255_s29, %s2251_s28 }
  0x12   : > { %p2383_p2 = scmp.eq.s32.totalorder %s1785_s12, 3  ;;  %s3519_s14 = smov (%p34_p0, %s33_s14), 0 }
  0x13   : > { %3465 = sst [smem:[#allocation14_spill]] %s3519_s14  ;;  %s3521_s15 = smov (!%p34_p0, %s36_s15), %s2271_s10 }
  0x14   : > { %s174_s18 = ssub.s32 %s2267_s9, %s3519_s14  ;;  %p2394_p3 = por %p2383_p2, %p188_p1 }
  0x15   : > { %p38_p4 = scmp.ge.s32.totalorder %s3521_s15, 2  ;;  %p194_p5 = scmp.ne.s32.totalorder %s2251_s28, %s2247_s27 }
  0x16   : > { %p2400_p6 = scmp.eq.s32.totalorder %s1786_s13, 3  ;;  %s204_s21 = sadd.s32 1, %s2243_s26 }
  0x17   : > { %s3523_s15 = smov (%p38_p4, %s3521_s15), 0  ;;  %p214_p8 = scmp.ne.s32.totalorder %s2243_s26, %s2239_s25 }
  0x18   : > { %3468 = sst [smem:[#allocation15_spill]] %s3523_s15  ;;  %p2409_p7 = por %p2400_p6, %p194_p5 }
  0x19   : > { %s173_s23 = ssub.s32 %s2271_s10, %s3523_s15  ;;  %p220_p9 = scmp.ne.s32.totalorder %s2239_s25, %s2235_s24 }
  0x1a   : > { %s175_s12 = sor.u32 %s174_s18, %s173_s23  ;;  %p202_p10 = scmp.eq.s32.totalorder %s173_s23, 0 }
  0x1b   : > { %p176_p11 = scmp.eq.s32.totalorder %s175_s12, 0  ;;  %p2421_p12 = por %p214_p8, %p2383_p2 }
  0x1c   : > { %s2426_s14 = scalar_select %p202_p10, %s2243_s26, %s204_s21  }
  0x1d   : > { %s2429_s9 = scalar_select %p176_p11, %s2255_s29, %s178_s16  }
  0x1e   : > { %3471 = sst [smem:[#allocation16_spill]] %s2426_s14  ;;  %p2433_p13 = por %p220_p9, %p2400_p6 }
  0x1f   : > { %3472 = sst [smem:[#allocation17_spill]] %s2429_s9  ;;  %p1789_p0 = scmp.ge.s32.totalorder %s2275_s11, 1 }
  0x20   : > { %p267_p1 = scmp.lt.s32.totalorder %s2275_s11, 5 }
  0x22   : > { %p268_p4 = pnand %p1789_p0, %p267_p1 }
  0x23   : > { %s3455_s17 = sand.u32 (!%p268_p4), 1, %s2251_s28   ;;  %s3456_s18 = sand.u32 (!%p268_p4), 1, %s2239_s25  }
  0x24   : > { %271 = sbr.rel (%p268_p4) target bundleno = 1194 (0x4aa), region = 44  ;;  %s1790_s16 = sshll.u32 (!%p268_p4), %s3455_s17, 6 }
  0x25   : > { %s2444_s20 = sshll.u32 (!%p268_p4), %s2259_s30, 3  ;;  %p308_p2 = scmp.lt.s32.totalorder (!%p268_p4), %s2263_s8, 1 }
  0x26   : > { %p310_p5 = scmp.lt.s32.totalorder (!%p268_p4), %s2444_s20, 15  ;;  %s3474_s0 = sld [smem:[#allocation18_spill]] (!%p268_p4) }
  0x27   : > { %s2455_s26 = scalar_lea.vmem (!%p268_p4), [#allocation3], %s1790_s16  ;;  %s2459_s17 = scalar_lea.vmem (!%p268_p4), [#allocation5], %s3456_s18 }
  0x28   : > { %p1794_p6 = scmp.ne.s32.totalorder (!%p268_p4), %s2259_s30, 0 }
  0x29   : > { %s309_s21 = scalar_select %p308_p2, %s2263_s8, 1 }
  0x2a   : > { %s311_s23 = scalar_select %p310_p5, %s2444_s20, 15 }
  0x2b   : > { %s1792_s12 = sshll.u32 %s309_s21, 4  ;;  %321 = sbr.rel (%p1794_p6) target bundleno = 65 (0x41), region = 48 }
  0x2c   : > { %s313_s15 = sadd.s32 %s1792_s12, %s311_s23 }
  0x2d   : > { %s1793_s10 = sshll.u32 %s313_s15, 3 }
  0x2e   : > { %s2453_s14 = scalar_lea.vmem %s3474_s0, %s1793_s10 }
  0x30   : > { %v2277_v0 = vmov 0.0  }
  0x31   : > { %322 = vst [vmem:[#allocation2 + $0x30] sm:$0xff] %v2277_v0 }
  0x32   : > { %323 = vst [vmem:[#allocation2] sm:$0xff] %v2277_v0 }
  0x33   : > { %324 = vst [vmem:[#allocation2 + $0x58] sm:$0xff] %v2277_v0 }
  0x34   : > { %325 = vst [vmem:[#allocation2 + $0x18] sm:$0xff] %v2277_v0 }
  0x35   : > { %326 = vst [vmem:[#allocation2 + $0x50] sm:$0xff] %v2277_v0 }
  0x36   : > { %327 = vst [vmem:[#allocation2 + $0x68] sm:$0xff] %v2277_v0 }
  0x37   : > { %328 = vst [vmem:[#allocation2 + $0x8] sm:$0xff] %v2277_v0 }
  0x38   : > { %329 = vst [vmem:[#allocation2 + $0x48] sm:$0xff] %v2277_v0 }
  0x39   : > { %330 = vst [vmem:[#allocation2 + $0x40] sm:$0xff] %v2277_v0 }
  0x3a   : > { %331 = vst [vmem:[#allocation2 + $0x20] sm:$0xff] %v2277_v0 }
  0x3b   : > { %332 = vst [vmem:[#allocation2 + $0x10] sm:$0xff] %v2277_v0 }
  0x3c   : > { %333 = vst [vmem:[#allocation2 + $0x38] sm:$0xff] %v2277_v0 }
  0x3d   : > { %334 = vst [vmem:[#allocation2 + $0x60] sm:$0xff] %v2277_v0 }
  0x3e   : > { %335 = vst [vmem:[#allocation2 + $0x70] sm:$0xff] %v2277_v0 }
  0x3f   : > { %336 = vst [vmem:[#allocation2 + $0x78] sm:$0xff] %v2277_v0 }
  0x40   : > { %337 = vst [vmem:[#allocation2 + $0x28] sm:$0xff] %v2277_v0 }
  0x41 PF: > { %v344_v1 = vld [vmem:[%s2453_s14 + $0x30] sm:$0xff]  ;;  %vm346_vm0 = vcmask 523264   ;;  %v338_v3 = vld [vmem:[%s2453_s14] sm:$0xff]  ;;  %v345_v7 = vld [vmem:[%s2453_s14 + $0x38] sm:$0xff]  ;;  %v2278_v15 = vmov 64.0   ;;  %s3477_s1 = sld [smem:[#allocation19_spill]] }
  0x42   : > { %v340_v2 = vld [vmem:[%s2453_s14 + $0x10] sm:$0xff]  ;;  %v365_v4 = vsel %vm346_vm0, %v344_v1, 0.0  ;;  %v347_v6 = vsel %vm346_vm0, %v338_v3, 0.0  ;;  %v341_v8 = vld [vmem:[%s2453_s14 + $0x18] sm:$0xff]  ;;  %v339_v9 = vld [vmem:[%s2453_s14 + $0x8] sm:$0xff]  ;;  %v368_v10 = vsel %vm346_vm0, %v345_v7, 0.0  ;;  %1977 = vrcp.f32 %v2278_v15 }
  0x43   : > { %v353_v5 = vsel %vm346_vm0, %v340_v2, 0.0  ;;  %366 = vadd.xlane.f32.xlu0 %v365_v4  ;;  %348 = vadd.xlane.f32.xlu1 %v347_v6  ;;  %v356_v11 = vsel %vm346_vm0, %v341_v8, 0.0  ;;  %v350_v12 = vsel %vm346_vm0, %v339_v9, 0.0  ;;  %v342_v13 = vld [vmem:[%s2453_s14 + $0x20] sm:$0xff]  ;;  %v2494_v38 = vld [vmem:[%s2453_s14 + $0x28] sm:$0xff]  ;;  %v572_v60 = vld [vmem:[%s3443_s3 + $0x90] sm:$0xff] }
  0x44   : > { %354 = vadd.xlane.f32.xlu2 %v353_v5  ;;  %v359_v14 = vsel %vm346_vm0, %v342_v13, 0.0  ;;  %v362_v43 = vsel %vm346_vm0, %v2494_v38, 0.0  ;;  %v575_v59 = vld [vmem:[%s3443_s3 + $0xa8] sm:$0xff]  ;;  %v569_v61 = vld [vmem:[%s3443_s3 + $0x78] sm:$0xff]  ;;  %v566_v62 = vld [vmem:[%s3443_s3 + $0x60] sm:$0xff]  ;;  %p1835_p8 = scmp.ne.s32.totalorder %s2259_s30, 1 }
  0x45   : > { %618 = vmatpush.msra.mxu0 %v575_v59  ;;  %1843 = vmatpush.msra.mxu2 %v575_v59  ;;  %v563_v63 = vld [vmem:[%s3443_s3 + $0x48] sm:$0xff]  ;;  %v560_v0 = vld [vmem:[%s3443_s3 + $0x30] sm:$0xff]  ;;  %v574_v5 = vld [vmem:[%s3443_s3 + $0xa0] sm:$0xff] }
  0x46   : > { %1842 = vmatpush.msra.mxu1 %v575_v59 }
  0x47   : > { %619 = vmatpush.msra.mxu0 %v572_v60  ;;  %1845 = vmatpush.msra.mxu2 %v572_v60 }
  0x48   : > { %v1978_v16 = vpop.eup %1977  ;;  %1844 = vmatpush.msra.mxu1 %v572_v60 }
  0x49   : > { %v372_v17 = vmul.f32 64.0, %v1978_v16  ;;  %vm376_vm1 = vweird.f32 %v1978_v16  ;;  %620 = vmatpush.msra.mxu0 %v569_v61  ;;  %1847 = vmatpush.msra.mxu2 %v569_v61 }
  0x4a   : > { %1846 = vmatpush.msra.mxu1 %v569_v61  ;;  %v2604_v61 = vld [vmem:[%s3442_s2] ss:$0 sm:$0xff] }
  0x4b   : > { %369 = vadd.xlane.f32.xlu0 %v368_v10  ;;  %351 = vadd.xlane.f32.xlu1 %v350_v12  ;;  %v373_v18 = vsub.f32 1.0, %v372_v17  ;;  %v568_v12 = vld [vmem:[%s3443_s3 + $0x70] sm:$0xff] }
  0x4c   : > { %357 = vadd.xlane.f32.xlu2 %v356_v11  ;;  %621 = vmatpush.msra.mxu0 %v566_v62 }
  0x4d   : > { %v374_v19 = vmul.f32 %v1978_v16, %v373_v18  ;;  %1849 = vmatpush.msra.mxu2 %v566_v62  ;;  %1848 = vmatpush.msra.mxu1 %v566_v62 }
  0x4e   : > { %622 = vmatpush.msra.mxu0 %v563_v63 }
  0x4f   : > { %v375_v20 = vadd.f32 %v1978_v16, %v374_v19  ;;  %1851 = vmatpush.msra.mxu2 %v563_v63  ;;  %1850 = vmatpush.msra.mxu1 %v563_v63 }
  0x50   : > { %623 = vmatpush.msra.mxu0 %v560_v0 }
  0x51   : > { %v2476_v21 = vsel %vm376_vm1, %v1978_v16, %v375_v20  ;;  %1853 = vmatpush.msra.mxu2 %v560_v0  ;;  %1852 = vmatpush.msra.mxu1 %v560_v0  ;;  %v562_v16 = vld [vmem:[%s3443_s3 + $0x40] sm:$0xff]  ;;  %v559_v20 = vld [vmem:[%s3443_s3 + $0x28] sm:$0xff] }
  0x53   : > { %360 = vadd.xlane.f32.xlu1 %v359_v14 }
  0xb6   : > { %v367_v22 = vpop.xlane.xlu0 %366  ;;  %v349_v25 = vpop.xlane.xlu1 %348 }
  0xb7   : > { %v355_v23 = vpop.xlane.xlu2 %354  ;;  %v384_v24 = vmul.f32 %v2476_v21, %v367_v22  ;;  %v378_v26 = vmul.f32 %v2476_v21, %v349_v25 }
  0xb8   : > { %v380_v35 = vmul.f32 %v2476_v21, %v355_v23 }
  0xb9   : > { %v2480_v27 = vsub.f32 %v344_v1, %v384_v24  ;;  %v2482_v28 = vsub.f32 %v338_v3, %v378_v26  ;;  %v557_v1 = vld [vmem:[%s3443_s3 + $0x18] sm:$0xff] }
  0xba   : > { %v2503_v44 = vsub.f32 %v340_v2, %v380_v35  ;;  %624 = vmatpush.msra.mxu0 %v557_v1  ;;  %1855 = vmatpush.msra.mxu2 %v557_v1  ;;  %v554_v2 = vld [vmem:[%s3443_s3] sm:$0xff]  ;;  %v577_v3 = vld [vmem:[%s3443_s3 + $0xb8] sm:$0xff] }
  0xbb   : > { %v400_v29 = vmul.f32 %v2480_v27, %v2480_v27  ;;  %v394_v30 = vmul.f32 %v2482_v28, %v2482_v28  ;;  %1854 = vmatpush.msra.mxu1 %v557_v1 }
  0xbc   : > { %v396_v50 = vmul.f32 %v2503_v44, %v2503_v44  ;;  %625 = vmatpush.msra.mxu0 %v554_v2  ;;  %1857 = vmatpush.msra.mxu2 %v554_v2 }
  0xbd   : > { %v420_v31 = vsel %vm346_vm0, %v400_v29, 0.0  ;;  %v402_v34 = vsel %vm346_vm0, %v394_v30, 0.0  ;;  %1856 = vmatpush.msra.mxu1 %v554_v2  ;;  %v556_v30 = vld [vmem:[%s3443_s3 + $0x10] sm:$0xff] }
  0xbe   : > { %421 = vadd.xlane.f32.xlu0 %v420_v31  ;;  %v370_v32 = vpop.xlane.xlu0 %369  ;;  %403 = vadd.xlane.f32.xlu1 %v402_v34  ;;  %v352_v39 = vpop.xlane.xlu1 %351  ;;  %v408_v54 = vsel %vm346_vm0, %v396_v50, 0.0 }
  0xbf   : > { %v358_v33 = vpop.xlane.xlu2 %357  ;;  %v385_v36 = vmul.f32 %v2476_v21, %v370_v32  ;;  %v379_v40 = vmul.f32 %v2476_v21, %v352_v39  ;;  %700 = vmatpush.msrb.mxu2 %v577_v3 }
  0xc0   : > { %v381_v37 = vmul.f32 %v2476_v21, %v358_v33 }
  0xc1   : > { %v2497_v41 = vsub.f32 %v345_v7, %v385_v36  ;;  %v2509_v47 = vsub.f32 %v339_v9, %v379_v40  ;;  %701 = vmatpush.msrb.mxu2 %v574_v5  ;;  %v571_v9 = vld [vmem:[%s3443_s3 + $0x88] sm:$0xff] }
  0xc2   : > { %v2499_v42 = vsub.f32 %v341_v8, %v381_v37 }
  0xc3   : > { %v401_v45 = vmul.f32 %v2497_v41, %v2497_v41  ;;  %v395_v51 = vmul.f32 %v2509_v47, %v2509_v47  ;;  %702 = vmatpush.msrb.mxu2 %v571_v9 }
  0xc4   : > { %v397_v46 = vmul.f32 %v2499_v42, %v2499_v42 }
  0xc5   : > { %v423_v48 = vsel %vm346_vm0, %v401_v45, 0.0  ;;  %v405_v55 = vsel %vm346_vm0, %v395_v51, 0.0  ;;  %703 = vmatpush.msrb.mxu2 %v568_v12 }
  0xc6   : > { %v411_v49 = vsel %vm346_vm0, %v397_v46, 0.0  ;;  %363 = vadd.xlane.f32.xlu0 %v362_v43  ;;  %424 = vadd.xlane.f32.xlu2 %v423_v48  ;;  %v361_v52 = vpop.xlane.xlu1 %360 }
  0xc7   : > { %412 = vadd.xlane.f32.xlu1 %v411_v49  ;;  %v382_v53 = vmul.f32 %v2476_v21, %v361_v52 }
  0xc9   : > { %v2520_v56 = vsub.f32 %v342_v13, %v382_v53  ;;  %v565_v13 = vld [vmem:[%s3443_s3 + $0x58] sm:$0xff] }
  0xca   : > { %704 = vmatpush.msrb.mxu2 %v565_v13 }
  0xcb   : > { %v398_v57 = vmul.f32 %v2520_v56, %v2520_v56 }
  0xcc   : > { %705 = vmatpush.msrb.mxu2 %v562_v16 }
  0xcd   : > { %v414_v58 = vsel %vm346_vm0, %v398_v57, 0.0  ;;  %v2597_v57 = vld [vmem:[%s3477_s1] ss:$0 sm:$0xff] }
  0xce   : > { %409 = vadd.xlane.f32.xlu0 %v408_v54  ;;  %406 = vadd.xlane.f32.xlu2 %v405_v55 }
  0xcf   : > { %706 = vmatpush.msrb.mxu2 %v559_v20 }
  0xd1   : > { %707 = vmatpush.msrb.mxu2 %v556_v30 }
  0xd6   : > { %415 = vadd.xlane.f32.xlu2 %v414_v58 }
 0x131   : > { %v422_v4 = vpop.xlane.xlu0 %421  ;;  %v404_v7 = vpop.xlane.xlu1 %403 }
 0x132   : > { %v432_v6 = vmul.f32 %v422_v4, %v2476_v21  ;;  %v426_v8 = vmul.f32 %v404_v7, %v2476_v21 }
 0x134   : > { %v440_v10 = vadd.f32 1e-05, %v432_v6  ;;  %v434_v11 = vadd.f32 1e-05, %v426_v8 }
 0x136   : > { %1979 = vrsqrt.f32 %v440_v10  ;;  %vm448_vm2 = vweird.f32 %v434_v11  ;;  %vm508_vm5 = vweird.f32 %v440_v10 }
 0x137   : > { %1981 = vrsqrt.f32 %v434_v11 }
 0x139   : > { %v364_v14 = vpop.xlane.xlu0 %363  ;;  %v425_v15 = vpop.xlane.xlu2 %424 }
 0x13a   : > { %v383_v17 = vmul.f32 %v2476_v21, %v364_v14  ;;  %v433_v18 = vmul.f32 %v425_v15, %v2476_v21  ;;  %v413_v19 = vpop.xlane.xlu1 %412 }
 0x13b   : > { %v429_v25 = vmul.f32 %v413_v19, %v2476_v21 }
 0x13c   : > { %v1980_v22 = vpop.eup %1979  ;;  %v2575_v23 = vsub.f32 %v2494_v38, %v383_v17  ;;  %v441_v24 = vadd.f32 1e-05, %v433_v18 }
 0x13d   : > { %v1982_v26 = vpop.eup %1981  ;;  %v503_v29 = vmul.f32 %v1980_v22, %v440_v10  ;;  %v2583_v35 = vadd.f32 1e-05, %v429_v25  ;;  %vm509_vm4 = vweird.f32 %v1980_v22 }
 0x13e   : > { %v443_v31 = vmul.f32 %v1982_v26, %v434_v11  ;;  %1983 = vrsqrt.f32 %v441_v24  ;;  %v399_v33 = vmul.f32 %v2575_v23, %v2575_v23  ;;  %vm449_vm3 = vweird.f32 %v1982_v26  ;;  %vm510_vm7 = vmor %vm508_vm5, %vm509_vm4 }
 0x13f   : > { %v504_v32 = vmul.f32 %v1980_v22, %v503_v29  ;;  %1985 = vrsqrt.f32 %v2583_v35  ;;  %vm2590_vm6 = vmor %vm448_vm2, %vm449_vm3  ;;  %vm518_vm8 = vweird.f32 %v441_v24  ;;  %vm478_vm4 = vweird.f32 %v2583_v35 }
 0x140   : > { %v444_v34 = vmul.f32 %v1982_v26, %v443_v31  ;;  %v417_v37 = vsel %vm346_vm0, %v399_v33, 0.0 }
 0x141   : > { %v505_v36 = vmul.f32 0.5, %v504_v32  ;;  %v410_v38 = vpop.xlane.xlu0 %409  ;;  %v407_v39 = vpop.xlane.xlu2 %406  ;;  %418 = vadd.xlane.f32.xlu0 %v417_v37 }
 0x142   : > { %v445_v40 = vmul.f32 0.5, %v444_v34  ;;  %v428_v43 = vmul.f32 %v410_v38, %v2476_v21  ;;  %v427_v45 = vmul.f32 %v407_v39, %v2476_v21 }
 0x143   : > { %v506_v46 = vsub.f32 1.5, %v505_v36 }
 0x144   : > { %v1984_v48 = vpop.eup %1983  ;;  %v446_v49 = vsub.f32 1.5, %v445_v40  ;;  %v436_v50 = vadd.f32 1e-05, %v428_v43  ;;  %v435_v51 = vadd.f32 1e-05, %v427_v45 }
 0x145   : > { %v507_v52 = vmul.f32 %v1980_v22, %v506_v46  ;;  %v513_v54 = vmul.f32 %v1984_v48, %v441_v24  ;;  %vm519_vm9 = vweird.f32 %v1984_v48  ;;  %v2608_v2 = vpop.eup %1985 }
 0x146   : > { %v447_v55 = vmul.f32 %v1982_v26, %v446_v49  ;;  %1987 = vrsqrt.f32 %v436_v50  ;;  %vm520_vm10 = vmor %vm518_vm8, %vm519_vm9  ;;  %vm458_vm11 = vweird.f32 %v435_v51  ;;  %vm468_vm13 = vweird.f32 %v436_v50 }
 0x147   : > { %v511_v58 = vsel %vm510_vm7, %v1980_v22, %v507_v52  ;;  %v514_v59 = vmul.f32 %v1984_v48, %v513_v54  ;;  %1989 = vrsqrt.f32 %v435_v51  ;;  %vm479_vm5 = vweird.f32 %v2608_v2 }
 0x148   : > { %v451_v60 = vsel %vm2590_vm6, %v1982_v26, %v447_v55  ;;  %v528_v62 = vmul.f32 %v511_v58, %v2480_v27  ;;  %vm480_vm7 = vmor %vm478_vm4, %vm479_vm5 }
 0x149   : > { %v515_v63 = vmul.f32 0.5, %v514_v59  ;;  %v416_v0 = vpop.xlane.xlu2 %415  ;;  %v522_v1 = vmul.f32 %v451_v60, %v2482_v28  ;;  %v473_v28 = vmul.f32 %v2608_v2, %v2583_v35  ;;  %v573_v59 = vld [vmem:[%s3443_s3 + $0x98] sm:$0xff]  ;;  %v570_v60 = vld [vmem:[%s3443_s3 + $0x80] sm:$0xff] }
 0x14a   : > { %v430_v3 = vmul.f32 %v416_v0, %v2476_v21  ;;  %v540_v4 = vmul.f32 %v2597_v57, %v528_v62  ;;  %v567_v62 = vld [vmem:[%s3443_s3 + $0x68] sm:$0xff]  ;;  %v561_v0 = vld [vmem:[%s3443_s3 + $0x38] sm:$0xff] }
 0x14b   : > { %v516_v5 = vsub.f32 1.5, %v515_v63  ;;  %v534_v6 = vmul.f32 %v2597_v57, %v522_v1  ;;  %v474_v18 = vmul.f32 %v2608_v2, %v473_v28  ;;  %v564_v63 = vld [vmem:[%s3443_s3 + $0x50] sm:$0xff] }
 0x14c   : > { %v1988_v7 = vpop.eup %1987  ;;  %v438_v8 = vadd.f32 1e-05, %v430_v3  ;;  %v2614_v27 = vadd.f32 %v2604_v61, %v540_v4  ;;  %v558_v3 = vld [vmem:[%s3443_s3 + $0x20] sm:$0xff] }
 0x14d   : > { %v1990_v9 = vpop.eup %1989  ;;  %v517_v10 = vmul.f32 %v1984_v48, %v516_v5  ;;  %v463_v11 = vmul.f32 %v1988_v7, %v436_v50  ;;  %v2619_v12 = vadd.f32 %v2604_v61, %v534_v6  ;;  %vm469_vm14 = vweird.f32 %v1988_v7  ;;  %v555_v5 = vld [vmem:[%s3443_s3 + $0x8] sm:$0xff] }
 0x14e   : > { %v453_v13 = vmul.f32 %v1990_v9, %v435_v51  ;;  %1991 = vrsqrt.f32 %v438_v8  ;;  %1801 = vmatmul.msk.f32.vlgmr.msra.gmra.mxu2 %vm346_vm0, %v2614_v27  ;;  %vm459_vm12 = vweird.f32 %v1990_v9  ;;  %v475_v31 = vmul.f32 0.5, %v474_v18  ;;  %vm2633_vm1 = vmor %vm468_vm13, %vm469_vm14 }
 0x14f   : > { %v521_v14 = vsel %vm520_vm10, %v1984_v48, %v517_v10  ;;  %v464_v15 = vmul.f32 %v1988_v7, %v463_v11  ;;  %1795 = vmatmul.msk.f32.vlgmr.msra.gmra.mxu0 %vm346_vm0, %v2619_v12  ;;  %vm460_vm15 = vmor %vm458_vm11, %vm459_vm12  ;;  %vm488_vm2 = vweird.f32 %v438_v8 }
 0x150   : > { %v454_v16 = vmul.f32 %v1990_v9, %v453_v13  ;;  %v529_v17 = vmul.f32 %v521_v14, %v2497_v41  ;;  %v476_v39 = vsub.f32 1.5, %v475_v31 }
 0x151   : > { %v465_v19 = vmul.f32 0.5, %v464_v15 }
 0x152   : > { %v455_v20 = vmul.f32 0.5, %v454_v16  ;;  %v541_v22 = vmul.f32 %v2597_v57, %v529_v17 }
 0x153   : > { %v466_v24 = vsub.f32 1.5, %v465_v19 }
 0x154   : > { %v1992_v25 = vpop.eup %1991  ;;  %v456_v26 = vsub.f32 1.5, %v455_v20  ;;  %v2629_v29 = vadd.f32 %v2604_v61, %v541_v22 }
 0x155   : > { %v483_v30 = vmul.f32 %v1992_v25, %v438_v8  ;;  %v467_v41 = vmul.f32 %v1988_v7, %v466_v24  ;;  %vm489_vm3 = vweird.f32 %v1992_v25 }
 0x156   : > { %v457_v32 = vmul.f32 %v1990_v9, %v456_v26  ;;  %1802 = vmatmul.msk.f32.gmra.mxu2 %vm346_vm0, %v2629_v29  ;;  %vm490_vm6 = vmor %vm488_vm2, %vm489_vm3 }
 0x157   : > { %v484_v34 = vmul.f32 %v1992_v25, %v483_v30  ;;  %v471_v40 = vsel %vm2633_vm1, %v1988_v7, %v467_v41 }
 0x158   : > { %v461_v36 = vsel %vm460_vm15, %v1990_v9, %v457_v32  ;;  %v524_v49 = vmul.f32 %v471_v40, %v2503_v44 }
 0x159   : > { %v485_v37 = vmul.f32 0.5, %v484_v34  ;;  %v523_v38 = vmul.f32 %v461_v36, %v2509_v47  ;;  %v477_v47 = vmul.f32 %v2608_v2, %v476_v39 }
 0x15a   : > { %v536_v51 = vmul.f32 %v2597_v57, %v524_v49 }
 0x15b   : > { %v486_v43 = vsub.f32 1.5, %v485_v37  ;;  %v535_v45 = vmul.f32 %v2597_v57, %v523_v38  ;;  %v481_v52 = vsel %vm480_vm7, %v2608_v2, %v477_v47 }
 0x15c   : > { %v548_v54 = vadd.f32 %v2604_v61, %v536_v51  ;;  %v525_v55 = vmul.f32 %v481_v52, %v2499_v42  ;;  %v576_v42 = vld [vmem:[%s3443_s3 + $0xb0] sm:$0xff] }
 0x15d   : > { %v487_v46 = vmul.f32 %v1992_v25, %v486_v43  ;;  %v2644_v48 = vadd.f32 %v2604_v61, %v535_v45  ;;  %659 = vmatpush.msrb.mxu1 %v576_v42 }
 0x15e   : > { %1811 = vmatmul.msk.f32.vlgmr.msrb.gmra.mxu2 %vm346_vm0, %v2619_v12 }
 0x15f   : > { %v491_v50 = vsel %vm490_vm6, %v1992_v25, %v487_v46  ;;  %1796 = vmatmul.msk.f32.gmra.mxu0 %vm346_vm0, %v2644_v48  ;;  %660 = vmatpush.msrb.mxu1 %v573_v59 }
 0x160   : > { %v526_v35 = vmul.f32 %v491_v50, %v2520_v56  ;;  %v537_v56 = vmul.f32 %v2597_v57, %v525_v55 }
 0x161   : > { %661 = vmatpush.msrb.mxu1 %v570_v60 }
 0x162   : > { %v538_v53 = vmul.f32 %v2597_v57, %v526_v35  ;;  %v549_v58 = vadd.f32 %v2604_v61, %v537_v56 }
 0x163   : > { %662 = vmatpush.msrb.mxu1 %v567_v62 }
 0x164   : > { %v2657_v44 = vadd.f32 %v2604_v61, %v538_v53 }
 0x165   : > { %663 = vmatpush.msrb.mxu1 %v564_v63 }
 0x166   : > { %1799 = vmatmul.msk.f32.vlgmr.msra.gmra.mxu1 %vm346_vm0, %v2657_v44  ;;  %1812 = vmatmul.msk.f32.gmra.mxu2 %vm346_vm0, %v2644_v48 }
 0x167   : > { %1797 = vmatmul.msk.f32.gmra.mxu0 %vm346_vm0, %v548_v54  ;;  %664 = vmatpush.msrb.mxu1 %v561_v0 }
 0x169   : > { %665 = vmatpush.msrb.mxu1 %v558_v3 }
 0x16b   : > { %666 = vmatpush.msrb.mxu1 %v555_v5 }
 0x16e   : > { %1813 = vmatmul.msk.f32.gmra.mxu2 %vm346_vm0, %v548_v54 }
 0x16f   : > { %1798 = vmatmul.msk.f32.gmra.mxu0 %vm346_vm0, %v549_v58 }
 0x176   : > { %1814 = vmatmul.msk.f32.gmra.mxu2 %vm346_vm0, %v549_v58 }
 0x17e   : > { %1815 = vmatmul.msk.f32.gmra.mxu2 %vm346_vm0, %v2657_v44 }
 0x1b4   : > { %v419_v1 = vpop.xlane.xlu0 %418 }
 0x1b5   : > { %v431_v2 = vmul.f32 %v419_v1, %v2476_v21 }
 0x1b7   : > { %v439_v4 = vadd.f32 1e-05, %v431_v2 }
 0x1b9   : > { %1993 = vrsqrt.f32 %v439_v4  ;;  %vm498_vm9 = vweird.f32 %v439_v4 }
 0x1bf   : > { %v1994_v6 = vpop.eup %1993 }
 0x1c0   : > { %v493_v7 = vmul.f32 %v1994_v6, %v439_v4  ;;  %vm499_vm8 = vweird.f32 %v1994_v6 }
 0x1c1   : > { %vm500_vm10 = vmor %vm498_vm9, %vm499_vm8 }
 0x1c2   : > { %v494_v8 = vmul.f32 %v1994_v6, %v493_v7 }
 0x1c4   : > { %v495_v9 = vmul.f32 0.5, %v494_v8 }
 0x1c6   : > { %v496_v10 = vsub.f32 1.5, %v495_v9 }
 0x1c8   : > { %v497_v28 = vmul.f32 %v1994_v6, %v496_v10 }
 0x1ca   : > { %v501_v21 = vsel %vm500_vm10, %v1994_v6, %v497_v28 }
 0x1cb   : > { %v527_v11 = vmul.f32 %v501_v21, %v2575_v23  ;;  %v2714_v23 = vld [vmem:[%s3444_s4] sm:$0x7] }
 0x1cd   : > { %v539_v13 = vmul.f32 %v2597_v57, %v527_v11  ;;  %v2717_v57 = vperm.slane %v2714_v23, 2 }
 0x1cf   : > { %v551_v14 = vadd.f32 %v2604_v61, %v539_v13 }
 0x1d1   : > { %v2701_v15 = vpop.f32.mrf.mxu2  ;;  %1800 = vmatmul.msk.f32.gmra.mxu1 %vm346_vm0, %v551_v14  ;;  %1816 = vmatmul.msk.f32.gmra.mxu2 %vm346_vm0, %v551_v14 }
 0x1d9   : > { %v2705_v16 = vpop.f32.mrf.mxu2  ;;  %1803 = vmatmul.msk.f32.vlgmr.msrb.gmra.mxu1 %vm346_vm0, %v2619_v12  ;;  %1817 = vmatmul.msk.f32.gmra.mxu2 %vm346_vm0, %v2614_v27 }
 0x1e1   : > { %v709_v61 = vpop.f32.mrf.mxu2  ;;  %1804 = vmatmul.msk.f32.gmra.mxu1 %vm346_vm0, %v2644_v48  ;;  %1818 = vmatmul.msk.f32.gmra.mxu2 %vm346_vm0, %v2629_v29  ;;  %v2738_v48 = vld [vmem:[%s3445_s5 + $0x2] ss:$0 sm:$0xff] }
 0x1e2   : > { %v710_v17 = vadd.f32 %v709_v61, %v2717_v57 }
 0x1e4   : > { %v735_v12 = vsub.f32 0.0, %v710_v17 }
 0x1e6   : > { %v761_v18 = vmul.f32 1.442695, %v735_v12 }
 0x1e8   : > { %1995 = vpow2.f32 %v761_v18 }
 0x1e9   : > { %v712_v19 = vpop.f32.mrf.mxu2  ;;  %1805 = vmatmul.msk.f32.gmra.mxu1 %vm346_vm0, %v548_v54  ;;  %v2753_v54 = vld [vmem:[%s3445_s5 + $0x3] ss:$0 sm:$0xff] }
 0x1ea   : > { %v2726_v20 = vadd.f32 %v712_v19, %v2717_v57 }
 0x1ec   : > { %v738_v22 = vsub.f32 0.0, %v2726_v20 }
 0x1ee   : > { %v1996_v24 = vpop.eup %1995  ;;  %v767_v26 = vmul.f32 1.442695, %v738_v22 }
 0x1ef   : > { %v807_v25 = vadd.f32 1.0, %v1996_v24 }
 0x1f1   : > { %1997 = vrcp.f32 %v807_v25  ;;  %v715_v30 = vpop.f32.mrf.mxu2  ;;  %1806 = vmatmul.msk.f32.gmra.mxu1 %vm346_vm0, %v549_v58  ;;  %v868_v37 = vand.u32 2147483647, %v807_v25  ;;  %v870_v38 = vand.u32 2147483648, %v807_v25  ;;  %vm864_vm12 = vweird.f32 %v807_v25 }
 0x1f2   : > { %1999 = vpow2.f32 %v767_v26  ;;  %v2733_v40 = vadd.f32 %v715_v30, %v2717_v57 }
 0x1f3   : > { %v871_v45 = vor.u32 1.1754944e-38, %v870_v38  ;;  %vm869_vm14 = vcmp.eq.f32.partialorder %v868_v37, 8.507059e+37  ;;  %v627_v37 = vpop.f32.mrf.mxu0 }
 0x1f4   : > { %v741_v49 = vsub.f32 0.0, %v2733_v40 }
 0x1f6   : > { %v773_v53 = vmul.f32 1.442695, %v741_v49 }
 0x1f7   : > { %v1998_v31 = vpop.eup %1997 }
 0x1f8   : > { %v860_v41 = vmul.f32 %v1998_v31, %v807_v25  ;;  %v2000_v32 = vpop.eup %1999  ;;  %vm865_vm11 = vweird.f32 %v1998_v31 }
 0x1f9   : > { %v718_v33 = vpop.f32.mrf.mxu2  ;;  %v810_v36 = vadd.f32 1.0, %v2000_v32  ;;  %1807 = vmatmul.msk.f32.gmra.mxu1 %vm346_vm0, %v2657_v44  ;;  %vm866_vm13 = vmor %vm864_vm12, %vm865_vm11 }
 0x1fa   : > { %v861_v34 = vsub.f32 1.0, %v860_v41  ;;  %v2742_v50 = vadd.f32 %v718_v33, %v2717_v57 }
 0x1fb   : > { %2001 = vrcp.f32 %v810_v36  ;;  %v915_v62 = vand.u32 2147483648, %v810_v36  ;;  %v913_v2 = vand.u32 2147483647, %v810_v36  ;;  %vm909_vm1 = vweird.f32 %v810_v36 }
 0x1fc   : > { %v862_v39 = vmul.f32 %v1998_v31, %v861_v34  ;;  %v744_v56 = vsub.f32 0.0, %v2742_v50  ;;  %2003 = vpow2.f32 %v773_v53 }
 0x1fd   : > { %v916_v5 = vor.u32 1.1754944e-38, %v915_v62  ;;  %vm914_vm3 = vcmp.eq.f32.partialorder %v913_v2, 8.507059e+37  ;;  %v630_v62 = vpop.f32.mrf.mxu0 }
 0x1fe   : > { %v863_v43 = vadd.f32 %v1998_v31, %v862_v39  ;;  %v779_v60 = vmul.f32 1.442695, %v744_v56 }
 0x200   : > { %v867_v46 = vsel %vm866_vm13, %v1998_v31, %v863_v43  ;;  %2005 = vpow2.f32 %v779_v60 }
 0x201   : > { %v872_v47 = vsel %vm869_vm14, %v871_v45, %v867_v46  ;;  %v721_v35 = vpop.f32.mrf.mxu2  ;;  %v2002_v51 = vpop.eup %2001  ;;  %1808 = vmatmul.msk.f32.gmra.mxu1 %vm346_vm0, %v551_v14 }
 0x202   : > { %v2744_v52 = vmul.f32 %v872_v47, %v710_v17  ;;  %v2748_v44 = vadd.f32 %v721_v35, %v2717_v57  ;;  %v905_v55 = vmul.f32 %v2002_v51, %v810_v36  ;;  %vm910_vm15 = vweird.f32 %v2002_v51  ;;  %v2004_v4 = vpop.eup %2003 }
 0x203   : > { %vm911_vm2 = vmor %vm909_vm1, %vm910_vm15  ;;  %v813_v7 = vadd.f32 1.0, %v2004_v4 }
 0x204   : > { %v747_v58 = vsub.f32 0.0, %v2748_v44  ;;  %v1235_v42 = vmul.f32 %v2738_v48, %v2744_v52  ;;  %v906_v59 = vsub.f32 1.0, %v905_v55 }
 0x205   : > { %v958_v18 = vand.u32 2147483647, %v813_v7  ;;  %v960_v19 = vand.u32 2147483648, %v813_v7  ;;  %vm954_vm5 = vweird.f32 %v813_v7 }
 0x206   : > { %v785_v63 = vmul.f32 1.442695, %v747_v58  ;;  %v1245_v0 = vadd.f32 %v2753_v54, %v1235_v42  ;;  %v907_v1 = vmul.f32 %v2002_v51, %v906_v59  ;;  %v2006_v10 = vpop.eup %2005  ;;  %v2782_v59 = vperm.slane %v2714_v23, 0 }
 0x207   : > { %v816_v21 = vadd.f32 1.0, %v2006_v10  ;;  %vm959_vm7 = vcmp.eq.f32.partialorder %v958_v18, 8.507059e+37  ;;  %v961_v30 = vor.u32 1.1754944e-38, %v960_v19 }
 0x208   : > { %1285 = vxpose.xlu1.b32.start [1/8] (short) %v1245_v0, 128  ;;  %v908_v3 = vadd.f32 %v2002_v51, %v907_v1  ;;  %2007 = vpow2.f32 %v785_v63  ;;  %v2789_v0 = vadd.f32 %v627_v37, %v2782_v59 }
 0x209   : > { %1809 = vmatmul.msk.f32.gmra.mxu1 %vm346_vm0, %v2614_v27  ;;  %2009 = vrcp.f32 %v813_v7  ;;  %v1005_v31 = vand.u32 2147483648, %v816_v21  ;;  %v1003_v33 = vand.u32 2147483647, %v816_v21  ;;  %vm999_vm9 = vweird.f32 %v816_v21 }
 0x20a   : > { %v912_v6 = vsel %vm911_vm2, %v2002_v51, %v908_v3  ;;  %2011 = vrcp.f32 %v816_v21  ;;  %v733_v2 = vsub.f32 0.0, %v2789_v0  ;;  %v633_v3 = vpop.f32.mrf.mxu0 }
 0x20b   : > { %v917_v8 = vsel %vm914_vm3, %v916_v5, %v912_v6  ;;  %v1006_v43 = vor.u32 1.1754944e-38, %v1005_v31  ;;  %vm1004_vm12 = vcmp.eq.f32.partialorder %v1003_v33, 8.507059e+37  ;;  %v2796_v6 = vadd.f32 %v630_v62, %v2782_v59 }
 0x20c   : > { %v2763_v9 = vmul.f32 %v917_v8, %v2726_v20  ;;  %v757_v5 = vmul.f32 1.442695, %v733_v2  ;;  %v2803_v8 = vadd.f32 %v2701_v15, %v2782_v59 }
 0x20d   : > { %v736_v10 = vsub.f32 0.0, %v2796_v6 }
 0x20e   : > { %v1236_v28 = vmul.f32 %v2738_v48, %v2763_v9  ;;  %v2008_v11 = vpop.eup %2007 }
 0x20f   : > { %v819_v13 = vadd.f32 1.0, %v2008_v11  ;;  %v2010_v27 = vpop.eup %2009  ;;  %v751_v11 = vsub.f32 0.0, %v2803_v8 }
 0x210   : > { %v1246_v14 = vadd.f32 %v2753_v54, %v1236_v28  ;;  %v950_v61 = vmul.f32 %v2010_v27, %v813_v7  ;;  %v2012_v12 = vpop.eup %2011  ;;  %vm955_vm4 = vweird.f32 %v2010_v27  ;;  %v639_v7 = vpop.f32.mrf.mxu1 }
 0x211   : > { %1810 = vmatmul.msk.f32.gmra.mxu1 %vm346_vm0, %v2629_v29  ;;  %2013 = vrcp.f32 %v819_v13  ;;  %v995_v22 = vmul.f32 %v2012_v12, %v816_v21  ;;  %vm956_vm6 = vmor %vm954_vm5, %vm955_vm4  ;;  %vm1000_vm8 = vweird.f32 %v2012_v12  ;;  %v1050_v46 = vand.u32 2147483648, %v819_v13 }
 0x212   : > { %1286 = vxpose.xlu1.b32.cont [2/8] (short) %v1246_v14, 128  ;;  %v951_v17 = vsub.f32 1.0, %v950_v61  ;;  %vm1001_vm10 = vmor %vm999_vm9, %vm1000_vm8  ;;  %v1048_v35 = vand.u32 2147483647, %v819_v13  ;;  %vm1044_vm13 = vweird.f32 %v819_v13  ;;  %2015 = vpow2.f32 %v757_v5  ;;  %v636_v15 = vpop.f32.mrf.mxu0 }
 0x213   : > { %v996_v26 = vsub.f32 1.0, %v995_v22  ;;  %v1051_v58 = vor.u32 1.1754944e-38, %v1050_v46  ;;  %v2808_v21 = vadd.f32 %v639_v7, %v2782_v59  ;;  %v2815_v19 = vadd.f32 %v636_v15, %v2782_v59 }
 0x214   : > { %v952_v20 = vmul.f32 %v2010_v27, %v951_v17  ;;  %vm1049_vm15 = vcmp.eq.f32.partialorder %v1048_v35, 8.507059e+37  ;;  %v793_v17 = vmul.f32 1.442695, %v751_v11 }
 0x215   : > { %v997_v32 = vmul.f32 %v2012_v12, %v996_v26  ;;  %v745_v61 = vsub.f32 0.0, %v2808_v21 }
 0x216   : > { %v953_v25 = vadd.f32 %v2010_v27, %v952_v20  ;;  %v2820_v20 = vadd.f32 %v2705_v16, %v2782_v59 }
 0x217   : > { %v2014_v24 = vpop.eup %2013  ;;  %v998_v39 = vadd.f32 %v2012_v12, %v997_v32  ;;  %v781_v18 = vmul.f32 1.442695, %v745_v61 }
 0x218   : > { %v1040_v29 = vmul.f32 %v2014_v24, %v819_v13  ;;  %v957_v41 = vsel %vm956_vm6, %v2010_v27, %v953_v25  ;;  %vm1045_vm11 = vweird.f32 %v2014_v24  ;;  %v763_v13 = vmul.f32 1.442695, %v736_v10  ;;  %v2016_v14 = vpop.eup %2015 }
 0x219   : > { %v962_v34 = vsel %vm959_vm7, %v961_v30, %v957_v41  ;;  %v1002_v47 = vsel %vm1001_vm10, %v2012_v12, %v998_v39  ;;  %vm1046_vm14 = vmor %vm1044_vm13, %vm1045_vm11  ;;  %v2812_v12 = vadd.f32 1.0, %v2016_v14  ;;  %v742_v25 = vsub.f32 0.0, %v2815_v19 }
 0x21a   : > { %v1041_v36 = vsub.f32 1.0, %v1040_v29  ;;  %v2771_v38 = vmul.f32 %v962_v34, %v2733_v40  ;;  %v1007_v51 = vsel %vm1004_vm12, %v1006_v43, %v1002_v47  ;;  %2017 = vpow2.f32 %v763_v13 }
 0x21b   : > { %v2776_v55 = vmul.f32 %v1007_v51, %v2742_v50  ;;  %v754_v30 = vsub.f32 0.0, %v2820_v20  ;;  %v775_v33 = vmul.f32 1.442695, %v742_v25  ;;  %vm834_vm1 = vweird.f32 %v2812_v12 }
 0x21c   : > { %v1042_v45 = vmul.f32 %v2014_v24, %v1041_v36  ;;  %v1237_v49 = vmul.f32 %v2738_v48, %v2771_v38  ;;  %v840_v7 = vand.u32 2147483648, %v2812_v12 }
 0x21d   : > { %v1238_v42 = vmul.f32 %v2738_v48, %v2776_v55  ;;  %v799_v16 = vmul.f32 1.442695, %v754_v30 }
 0x21e   : > { %v1043_v53 = vadd.f32 %v2014_v24, %v1042_v45  ;;  %v1247_v40 = vadd.f32 %v2753_v54, %v1237_v49 }
 0x21f   : > { %v1248_v50 = vadd.f32 %v2753_v54, %v1238_v42 }
 0x220   : > { %v1047_v56 = vsel %vm1046_vm14, %v2014_v24, %v1043_v53  ;;  %1287 = vxpose.xlu1.b32.cont [3/8] (short) %v1247_v40, 128  ;;  %v2018_v22 = vpop.eup %2017  ;;  %v2850_v53 = vperm.slane %v2714_v23, 1 }
 0x221   : > { %v1052_v60 = vsel %vm1049_vm15, %v1051_v58, %v1047_v56  ;;  %v2824_v31 = vadd.f32 1.0, %v2018_v22 }
 0x222   : > { %v2785_v63 = vmul.f32 %v1052_v60, %v2748_v44  ;;  %v2799_v44 = vadd.f32 %v633_v3, %v2782_v59 }
 0x223   : > { %v885_v25 = vand.u32 2147483648, %v2824_v31  ;;  %vm879_vm5 = vweird.f32 %v2824_v31 }
 0x224   : > { %v1239_v1 = vmul.f32 %v2738_v48, %v2785_v63  ;;  %v739_v28 = vsub.f32 0.0, %v2799_v44 }
 0x226   : > { %v1249_v4 = vadd.f32 %v2753_v54, %v1239_v1  ;;  %v769_v27 = vmul.f32 1.442695, %v739_v28 }
 0x228   : > { %1288 = vxpose.xlu1.b32.cont [4/8] (short) %v1248_v50, 128  ;;  %2019 = vpow2.f32 %v769_v27  ;;  %v838_v50 = vand.u32 2147483647, %v2812_v12 }
 0x229   : > { %2021 = vpow2.f32 %v793_v17  ;;  %v883_v17 = vand.u32 2147483647, %v2824_v31 }
 0x22a   : > { %2023 = vrcp.f32 %v2812_v12  ;;  %vm2891_vm4 = vcmp.eq.f32.partialorder %v838_v50, 8.507059e+37 }
 0x22b   : > { %2025 = vpow2.f32 %v781_v18  ;;  %vm2911_vm6 = vcmp.eq.f32.partialorder %v883_v17, 8.507059e+37 }
 0x22c   : > { %2027 = vrcp.f32 %v2824_v31 }
 0x22e   : > { %v2020_v24 = vpop.eup %2019 }
 0x22f   : > { %v2022_v26 = vpop.eup %2021  ;;  %v2828_v41 = vadd.f32 1.0, %v2020_v24  ;;  %v841_v24 = vor.u32 1.1754944e-38, %v840_v7 }
 0x230   : > { %1289 = vxpose.xlu1.b32.cont [5/8] (short) %v1249_v4, 128  ;;  %v2826_v29 = vpop.eup %2023  ;;  %v2830_v34 = vadd.f32 1.0, %v2022_v26 }
 0x231   : > { %v2026_v32 = vpop.eup %2025  ;;  %v830_v36 = vmul.f32 %v2826_v29, %v2812_v12  ;;  %2029 = vrcp.f32 %v2828_v41  ;;  %vm835_vm2 = vweird.f32 %v2826_v29  ;;  %vm924_vm8 = vweird.f32 %v2828_v41 }
 0x232   : > { %v2836_v37 = vadd.f32 1.0, %v2026_v32  ;;  %2031 = vpow2.f32 %v775_v33  ;;  %v2840_v45 = vpop.eup %2027  ;;  %vm2887_vm3 = vmor %vm834_vm1, %vm835_vm2 }
 0x233   : > { %2033 = vrcp.f32 %v2830_v34  ;;  %v831_v43 = vsub.f32 1.0, %v830_v36  ;;  %v875_v51 = vmul.f32 %v2840_v45, %v2824_v31  ;;  %vm880_vm7 = vweird.f32 %v2840_v45 }
 0x234   : > { %2035 = vpow2.f32 %v799_v16  ;;  %vm2933_vm10 = vmor %vm879_vm5, %vm880_vm7  ;;  %vm1014_vm11 = vweird.f32 %v2836_v37 }
 0x235   : > { %2037 = vrcp.f32 %v2836_v37  ;;  %v832_v35 = vmul.f32 %v2826_v29, %v831_v43  ;;  %v876_v3 = vsub.f32 1.0, %v875_v51 }
 0x237   : > { %v2842_v46 = vpop.eup %2029  ;;  %v833_v2 = vadd.f32 %v2826_v29, %v832_v35  ;;  %v877_v22 = vmul.f32 %v2840_v45, %v876_v3 }
 0x238   : > { %v2032_v49 = vpop.eup %2031  ;;  %v920_v42 = vmul.f32 %v2842_v46, %v2828_v41  ;;  %vm925_vm9 = vweird.f32 %v2842_v46 }
 0x239   : > { %v2844_v47 = vpop.eup %2033  ;;  %v2856_v60 = vadd.f32 1.0, %v2032_v49  ;;  %v837_v18 = vsel %vm2887_vm3, %v2826_v29, %v833_v2  ;;  %v878_v35 = vadd.f32 %v2840_v45, %v877_v22  ;;  %vm2948_vm12 = vmor %vm924_vm8, %vm925_vm9  ;;  %v1020_v22 = vand.u32 2147483648, %v2836_v37 }
 0x23a   : > { %v2036_v40 = vpop.eup %2035  ;;  %v2875_v10 = vmul.f32 %v2844_v47, %v2830_v34  ;;  %v921_v11 = vsub.f32 1.0, %v920_v42  ;;  %v842_v29 = vsel %vm2891_vm4, %v841_v24, %v837_v18  ;;  %v928_v42 = vand.u32 2147483647, %v2828_v41 }
 0x23b   : > { %v2852_v58 = vpop.eup %2037  ;;  %v2877_v28 = vadd.f32 1.0, %v2036_v40  ;;  %2039 = vrcp.f32 %v2856_v60  ;;  %v882_v27 = vsel %vm2933_vm10, %v2840_v45, %v878_v35  ;;  %vm969_vm10 = vweird.f32 %v2856_v60 }
 0x23c   : > { %v1101_v32 = vsub.f32 1.0, %v2875_v10  ;;  %v922_v33 = vmul.f32 %v2842_v46, %v921_v11  ;;  %vm1015_vm13 = vweird.f32 %v2852_v58  ;;  %vm929_vm14 = vcmp.eq.f32.partialorder %v928_v42, 8.507059e+37 }
 0x23d   : > { %vm2982_vm15 = vmor %vm1014_vm11, %vm1015_vm13  ;;  %v973_v10 = vand.u32 2147483647, %v2856_v60 }
 0x23e   : > { %v923_v2 = vadd.f32 %v2842_v46, %v922_v33  ;;  %v2970_v33 = vld [vmem:[%s3445_s5] ss:$0 sm:$0xff] }
 0x240   : > { %v927_v45 = vsel %vm2948_vm12, %v2842_v46, %v923_v2  ;;  %v2973_v46 = vmul.f32 %v842_v29, %v2789_v0 }
 0x241   : > { %v2915_v49 = vpop.eup %2039 }
 0x242   : > { %v965_v11 = vmul.f32 %v2915_v49, %v2856_v60  ;;  %vm970_vm5 = vweird.f32 %v2915_v49 }
 0x24e   : > { %v642_v39 = vpop.f32.mrf.mxu1 }
 0x24f   : > { %v2865_v23 = vadd.f32 %v642_v39, %v2782_v59  ;;  %v1010_v59 = vmul.f32 %v2852_v58, %v2836_v37 }
 0x251   : > { %v748_v15 = vsub.f32 0.0, %v2865_v23  ;;  %v1011_v26 = vsub.f32 1.0, %v1010_v59  ;;  %v930_v59 = vand.u32 2147483648, %v2828_v41 }
 0x253   : > { %v787_v39 = vmul.f32 1.442695, %v748_v15  ;;  %v1012_v50 = vmul.f32 %v2852_v58, %v1011_v26  ;;  %v1018_v15 = vand.u32 2147483647, %v2836_v37  ;;  %v931_v24 = vor.u32 1.1754944e-38, %v930_v59 }
 0x254   : > { %v724_v56 = vpop.f32.mrf.mxu2 }
 0x255   : > { %v2859_v62 = vadd.f32 %v724_v56, %v2717_v57  ;;  %v886_v56 = vor.u32 1.1754944e-38, %v885_v25  ;;  %v1013_v17 = vadd.f32 %v2852_v58, %v1012_v50  ;;  %v966_v25 = vsub.f32 1.0, %v965_v11 }
 0x256   : > { %v668_v1 = vpop.f32.mrf.mxu1  ;;  %v932_v0 = vsel %vm929_vm14, %v931_v24, %v927_v45  ;;  %vm1019_vm1 = vcmp.eq.f32.partialorder %v1018_v15, 8.507059e+37  ;;  %v975_v11 = vand.u32 2147483648, %v2856_v60 }
 0x257   : > { %v750_v4 = vsub.f32 0.0, %v2859_v62  ;;  %v2870_v5 = vadd.f32 %v668_v1, %v2850_v53  ;;  %v967_v50 = vmul.f32 %v2915_v49, %v966_v25 }
 0x259   : > { %v791_v13 = vmul.f32 1.442695, %v750_v4  ;;  %v734_v14 = vsub.f32 0.0, %v2870_v5 }
 0x25b   : > { %2041 = vpow2.f32 %v791_v13  ;;  %v759_v12 = vmul.f32 1.442695, %v734_v14 }
 0x25c   : > { %2043 = vrcp.f32 %v2877_v28  ;;  %v727_v30 = vpop.f32.mrf.mxu2 }
 0x25d   : > { %2045 = vpow2.f32 %v759_v12  ;;  %v2906_v16 = vadd.f32 %v727_v30, %v2717_v57  ;;  %v887_v12 = vsel %vm2911_vm6, %v886_v56, %v882_v27 }
 0x25e   : > { %v671_v43 = vpop.f32.mrf.mxu1  ;;  %2047 = vpow2.f32 %v787_v39  ;;  %v2976_v39 = vmul.f32 %v2844_v47, %v1101_v32  ;;  %v1017_v32 = vsel %vm2982_vm15, %v2852_v58, %v1013_v17  ;;  %v2996_v37 = vmul.f32 %v887_v12, %v2796_v6 }
 0x25f   : > { %v753_v51 = vsub.f32 0.0, %v2906_v16  ;;  %v2921_v40 = vadd.f32 %v671_v43, %v2850_v53  ;;  %v3006_v58 = vmul.f32 %v2970_v33, %v2744_v52  ;;  %v3023_v17 = vadd.f32 %v2915_v49, %v967_v50 }
 0x261   : > { %v2042_v1 = vpop.eup %2041  ;;  %v797_v3 = vmul.f32 1.442695, %v753_v51  ;;  %v737_v4 = vsub.f32 0.0, %v2921_v40  ;;  %v1021_v51 = vor.u32 1.1754944e-38, %v1020_v22 }
 0x262   : > { %v2929_v7 = vpop.eup %2043  ;;  %v2940_v13 = vadd.f32 1.0, %v2042_v1 }
 0x263   : > { %v2046_v14 = vpop.eup %2045  ;;  %2049 = vpow2.f32 %v797_v3  ;;  %v765_v31 = vmul.f32 1.442695, %v737_v4  ;;  %v2989_v43 = vmul.f32 %v2929_v7, %v2877_v28  ;;  %v3009_v4 = vmul.f32 %v932_v0, %v2799_v44 }
 0x264   : > { %2051 = vrcp.f32 %v2940_v13  ;;  %v730_v18 = vpop.f32.mrf.mxu2  ;;  %v2960_v41 = vadd.f32 1.0, %v2046_v14  ;;  %v2048_v36 = vpop.eup %2047  ;;  %v3011_v6 = vsel %vm1019_vm1, %v1021_v51, %v1017_v32  ;;  %v1093_v14 = vand.u32 2147483647, %v2940_v13 }
 0x265   : > { %2053 = vpow2.f32 %v765_v31  ;;  %v2965_v26 = vadd.f32 %v730_v18, %v2717_v57  ;;  %v1095_v27 = vand.u32 2147483648, %v2940_v13  ;;  %v3025_v15 = vadd.f32 1.0, %v2048_v36 }
 0x266   : > { %v674_v30 = vpop.f32.mrf.mxu1  ;;  %2055 = vrcp.f32 %v2960_v41  ;;  %v853_v45 = vand.u32 2147483647, %v2960_v41  ;;  %v855_v24 = vand.u32 2147483648, %v2960_v41  ;;  %vm1089_vm3 = vweird.f32 %v2940_v13 }
 0x267   : > { %v756_v29 = vsub.f32 0.0, %v2965_v26  ;;  %v2999_v56 = vadd.f32 %v674_v30, %v2850_v53  ;;  %vm3032_vm4 = vcmp.eq.f32.partialorder %v1093_v14, 8.507059e+37  ;;  %v1096_v30 = vor.u32 1.1754944e-38, %v1095_v27 }
 0x268   : > { %vm849_vm6 = vweird.f32 %v2960_v41  ;;  %vm3041_vm9 = vcmp.eq.f32.partialorder %v853_v45, 8.507059e+37 }
 0x269   : > { %v2050_v35 = vpop.eup %2049  ;;  %v803_v2 = vmul.f32 1.442695, %v756_v29  ;;  %v740_v44 = vsub.f32 0.0, %v2999_v56 }
 0x26a   : > { %v2052_v42 = vpop.eup %2051  ;;  %v3002_v1 = vadd.f32 1.0, %v2050_v35 }
 0x26b   : > { %v2054_v3 = vpop.eup %2053  ;;  %v1085_v59 = vmul.f32 %v2052_v42, %v2940_v13  ;;  %vm1090_vm2 = vweird.f32 %v2052_v42  ;;  %v771_v0 = vmul.f32 1.442695, %v740_v44 }
 0x26c   : > { %2057 = vrcp.f32 %v3002_v1  ;;  %v2056_v52 = vpop.eup %2055  ;;  %v3019_v61 = vadd.f32 1.0, %v2054_v3  ;;  %vm1091_vm7 = vmor %vm1089_vm3, %vm1090_vm2  ;;  %v1138_v51 = vand.u32 2147483647, %v3002_v1  ;;  %v856_v3 = vor.u32 1.1754944e-38, %v855_v24 }
 0x26d   : > { %v1086_v31 = vsub.f32 1.0, %v1085_v59  ;;  %2059 = vpow2.f32 %v803_v2  ;;  %v845_v18 = vmul.f32 %v2056_v52, %v2960_v41  ;;  %vm850_vm8 = vweird.f32 %v2056_v52  ;;  %vm3088_vm2 = vmor %vm969_vm10, %vm970_vm5 }
 0x26e   : > { %v677_v22 = vpop.f32.mrf.mxu1  ;;  %2061 = vrcp.f32 %v3019_v61  ;;  %vm851_vm11 = vmor %vm849_vm6, %vm850_vm8  ;;  %vm1134_vm12 = vweird.f32 %v3002_v1  ;;  %vm3061_vm13 = vcmp.eq.f32.partialorder %v1138_v51, 8.507059e+37  ;;  %vm894_vm3 = vweird.f32 %v3019_v61 }
 0x26f   : > { %v1087_v12 = vmul.f32 %v2052_v42, %v1086_v31  ;;  %v846_v57 = vsub.f32 1.0, %v845_v18  ;;  %v3039_v32 = vadd.f32 %v677_v22, %v2850_v53  ;;  %2063 = vpow2.f32 %v771_v0 }
 0x270   : > { %v1140_v31 = vand.u32 2147483648, %v3002_v1 }
 0x271   : > { %v1088_v36 = vadd.f32 %v2052_v42, %v1087_v12  ;;  %v847_v35 = vmul.f32 %v2056_v52, %v846_v57  ;;  %v743_v22 = vsub.f32 0.0, %v3039_v32 }
 0x272   : > { %v2058_v29 = vpop.eup %2057 }
 0x273   : > { %v2060_v50 = vpop.eup %2059  ;;  %v1092_v2 = vsel %vm1091_vm7, %v2052_v42, %v1088_v36  ;;  %v1130_v59 = vmul.f32 %v2058_v29, %v3002_v1  ;;  %v848_v27 = vadd.f32 %v2056_v52, %v847_v35  ;;  %vm1135_vm14 = vweird.f32 %v2058_v29 }
 0x274   : > { %v1097_v14 = vsel %vm3032_vm4, %v1096_v30, %v1092_v2  ;;  %v3051_v44 = vadd.f32 1.0, %v2060_v50  ;;  %v2062_v18 = vpop.eup %2061  ;;  %v900_v35 = vand.u32 2147483648, %v3019_v61  ;;  %v777_v2 = vmul.f32 1.442695, %v743_v22  ;;  %vm1136_vm15 = vmor %vm1134_vm12, %vm1135_vm14 }
 0x275   : > { %v3054_v45 = vmul.f32 %v1097_v14, %v2859_v62  ;;  %v1131_v42 = vsub.f32 1.0, %v1130_v59  ;;  %v852_v12 = vsel %vm851_vm11, %v2056_v52, %v848_v27  ;;  %v890_v25 = vmul.f32 %v2062_v18, %v3019_v61  ;;  %v2064_v51 = vpop.eup %2063 }
 0x276   : > { %2065 = vrcp.f32 %v3051_v44  ;;  %v680_v62 = vpop.f32.mrf.mxu1  ;;  %v857_v41 = vsel %vm3041_vm9, %v856_v3, %v852_v12  ;;  %v1141_v52 = vor.u32 1.1754944e-38, %v1140_v31  ;;  %vm895_vm1 = vweird.f32 %v2062_v18 }
 0x277   : > { %v1240_v30 = vmul.f32 %v2738_v48, %v3054_v45  ;;  %v1132_v57 = vmul.f32 %v2058_v29, %v1131_v42  ;;  %v1190_v36 = vmul.f32 %v857_v41, %v2870_v5  ;;  %v891_v0 = vsub.f32 1.0, %v890_v25  ;;  %vm896_vm4 = vmor %vm894_vm3, %vm895_vm1 }
 0x278   : > { %v3074_v59 = vadd.f32 %v680_v62, %v2850_v53  ;;  %v898_v5 = vand.u32 2147483647, %v3019_v61  ;;  %v3081_v31 = vadd.f32 1.0, %v2064_v51  ;;  %2067 = vpow2.f32 %v777_v2 }
 0x279   : > { %v1133_v50 = vadd.f32 %v2058_v29, %v1132_v57  ;;  %v1250_v14 = vadd.f32 %v2753_v54, %v1240_v30  ;;  %v1253_v13 = vmul.f32 %v1190_v36, %v2973_v46  ;;  %v892_v3 = vmul.f32 %v2062_v18, %v891_v0 }
 0x27a   : > { %v746_v42 = vsub.f32 0.0, %v3074_v59  ;;  %2069 = vrcp.f32 %v3025_v15  ;;  %v901_v25 = vor.u32 1.1754944e-38, %v900_v35  ;;  %v972_v30 = vsel %vm3088_vm2, %v2915_v49, %v3023_v17 }
 0x27b   : > { %v1137_v27 = vsel %vm1136_vm15, %v2058_v29, %v1133_v50  ;;  %1290 = vxpose.xlu1.b32.cont [6/8] (short) %v1250_v14, 128  ;;  %1261 = vst [vmem:[%s2455_s26] sm:$0xff] %v1253_v13  ;;  %v893_v29 = vadd.f32 %v2062_v18, %v892_v3  ;;  %2071 = vrcp.f32 %v3081_v31  ;;  %vm899_vm5 = vcmp.eq.f32.partialorder %v898_v5, 8.507059e+37 }
 0x27c   : > { %v2066_v22 = vpop.eup %2065  ;;  %v1142_v1 = vsel %vm3061_vm13, %v1141_v52, %v1137_v27  ;;  %v1216_v61 = vmul.f32 %v2970_v33, %v2763_v9  ;;  %v783_v52 = vmul.f32 1.442695, %v746_v42  ;;  %v1183_v35 = vand.u32 2147483647, %v3051_v44 }
 0x27d   : > { %v1209_v12 = vmul.f32 %v1142_v1, %v2906_v16  ;;  %v1175_v62 = vmul.f32 %v2066_v22, %v3051_v44  ;;  %v897_v41 = vsel %vm896_vm4, %v2062_v18, %v893_v29  ;;  %v1185_v51 = vand.u32 2147483648, %v3051_v44  ;;  %v3118_v18 = vld [vmem:[%s3445_s5 + $0x1] ss:$0 sm:$0xff] }
 0x27e   : > { %v683_v24 = vpop.f32.mrf.mxu1  ;;  %v902_v57 = vsel %vm899_vm5, %v901_v25, %v897_v41  ;;  %v2068_v49 = vpop.eup %2067  ;;  %vm1180_vm6 = vweird.f32 %v2066_v22  ;;  %2073 = vpow2.f32 %v783_v52  ;;  %v976_v2 = vor.u32 1.1754944e-38, %v975_v11 }
 0x27f   : > { %v1241_v16 = vmul.f32 %v2738_v48, %v1209_v12  ;;  %v1176_v36 = vsub.f32 1.0, %v1175_v62  ;;  %v1193_v0 = vmul.f32 %v902_v57, %v2921_v40  ;;  %v3112_v50 = vadd.f32 %v683_v24, %v2850_v53 }
 0x280   : > { %v3120_v40 = vpop.eup %2069  ;;  %v3125_v13 = vadd.f32 1.0, %v2068_v49  ;;  %vm974_vm7 = vcmp.eq.f32.partialorder %v973_v10, 8.507059e+37  ;;  %vm1179_vm8 = vweird.f32 %v3051_v44  ;;  %v3132_v42 = vadd.f32 %v3118_v18, %v1216_v61 }
 0x281   : > { %v1177_v17 = vmul.f32 %v2066_v22, %v1176_v36  ;;  %v1251_v9 = vadd.f32 %v2753_v54, %v1241_v16  ;;  %v1254_v14 = vmul.f32 %v1193_v0, %v2996_v37  ;;  %v749_v3 = vsub.f32 0.0, %v3112_v50  ;;  %v2072_v5 = vpop.eup %2071  ;;  %vm1181_vm9 = vmor %vm1179_vm8, %vm1180_vm6 }
 0x282   : > { %v977_v46 = vsel %vm974_vm7, %v976_v2, %v972_v30  ;;  %v1186_v37 = vor.u32 1.1754944e-38, %v1185_v51  ;;  %v935_v11 = vmul.f32 %v2072_v5, %v3081_v31  ;;  %2075 = vrcp.f32 %v3125_v13 }
 0x283   : > { %v1178_v27 = vadd.f32 %v2066_v22, %v1177_v17  ;;  %1291 = vxpose.xlu1.b32.cont [7/8] (short) %v1251_v9, 128  ;;  %1262 = vst [vmem:[%s2455_s26 + $0x8] sm:$0xff] %v1254_v14  ;;  %vm1184_vm10 = vcmp.eq.f32.partialorder %v1183_v35, 8.507059e+37  ;;  %v789_v60 = vmul.f32 1.442695, %v749_v3  ;;  %v1217_v10 = vmul.f32 %v2970_v33, %v2771_v38 }
 0x284   : > { %v1055_v44 = vmul.f32 %v3120_v40, %v3025_v15  ;;  %v936_v25 = vsub.f32 1.0, %v935_v11  ;;  %v3144_v30 = vmul.f32 %v2970_v33, %v2776_v55  ;;  %v2074_v41 = vpop.eup %2073  ;;  %v945_v61 = vand.u32 2147483648, %v3081_v31 }
 0x285   : > { %v1182_v1 = vsel %vm1181_vm9, %v2066_v22, %v1178_v27  ;;  %v943_v22 = vand.u32 2147483647, %v3081_v31  ;;  %2077 = vpow2.f32 %v789_v60  ;;  %vm940_vm11 = vweird.f32 %v2072_v5 }
 0x286   : > { %v1187_v29 = vsel %vm1184_vm10, %v1186_v37, %v1182_v1  ;;  %v686_v62 = vpop.f32.mrf.mxu1  ;;  %v937_v16 = vmul.f32 %v2072_v5, %v936_v25  ;;  %v3149_v38 = vadd.f32 1.0, %v2074_v41  ;;  %v1221_v52 = vmul.f32 %v2970_v33, %v1209_v12 }
 0x287   : > { %v1212_v24 = vmul.f32 %v1187_v29, %v2965_v26  ;;  %v3152_v57 = vadd.f32 %v686_v62, %v2850_v53  ;;  %v1219_v26 = vmul.f32 %v2970_v33, %v2785_v63  ;;  %v1056_v35 = vsub.f32 1.0, %v1055_v44 }
 0x288   : > { %v2076_v0 = vpop.eup %2075  ;;  %v938_v51 = vadd.f32 %v2072_v5, %v937_v16  ;;  %vm939_vm12 = vweird.f32 %v3081_v31  ;;  %2079 = vrcp.f32 %v3149_v38  ;;  %v946_v49 = vor.u32 1.1754944e-38, %v945_v61 }
 0x289   : > { %v1242_v36 = vmul.f32 %v2738_v48, %v1212_v24  ;;  %v1222_v55 = vmul.f32 %v2970_v33, %v1212_v24  ;;  %vm941_vm13 = vmor %vm939_vm12, %vm940_vm11  ;;  %v980_v17 = vmul.f32 %v2076_v0, %v3125_v13  ;;  %v752_v48 = vsub.f32 0.0, %v3152_v57 }
 0x28a   : > { %v1220_v9 = vmul.f32 %v2970_v33, %v3054_v45  ;;  %v942_v12 = vsel %vm941_vm13, %v2072_v5, %v938_v51  ;;  %vm944_vm14 = vcmp.eq.f32.partialorder %v943_v22, 8.507059e+37  ;;  %v1231_v37 = vadd.f32 %v3118_v18, %v1221_v52 }
 0x28b   : > { %v1232_v63 = vadd.f32 %v3118_v18, %v1222_v55  ;;  %v1252_v2 = vadd.f32 %v2753_v54, %v1242_v36  ;;  %v2078_v14 = vpop.eup %2077  ;;  %v947_v3 = vsel %vm944_vm14, %v946_v49, %v942_v12  ;;  %v981_v31 = vsub.f32 1.0, %v980_v17 }
 0x28c   : > { %v795_v27 = vmul.f32 1.442695, %v752_v48  ;;  %v1196_v11 = vmul.f32 %v947_v3, %v2999_v56  ;;  %v988_v1 = vand.u32 2147483647, %v3125_v13  ;;  %v990_v60 = vand.u32 2147483648, %v3125_v13 }
 0x28d   : > { %v3171_v44 = vadd.f32 1.0, %v2078_v14  ;;  %1373 = vmatpush.msrb.mxu0 %v1232_v63  ;;  %1858 = vmatpush.msra.mxu3 %v1232_v63  ;;  %v982_v45 = vmul.f32 %v2076_v0, %v981_v31  ;;  %vm985_vm15 = vweird.f32 %v2076_v0  ;;  %v1198_v56 = vmul.f32 %v977_v46, %v2815_v19 }
 0x28e   : > { %v689_v33 = vpop.f32.mrf.mxu1  ;;  %2081 = vpow2.f32 %v795_v27  ;;  %1292 = vxpose.xlu1.b32.end [8/8] (short) %v1252_v2, 128  ;;  %v2080_v5 = vpop.eup %2079  ;;  %v1255_v29 = vmul.f32 %v1196_v11, %v3009_v4  ;;  %v1230_v25 = vadd.f32 %v3118_v18, %v1220_v9  ;;  %vm984_vm1 = vweird.f32 %v3125_v13 }
 0x28f   : > { %v3174_v54 = vadd.f32 %v689_v33, %v2850_v53  ;;  %2083 = vrcp.f32 %v3171_v44  ;;  %1374 = vmatpush.msrb.mxu0 %v1231_v37  ;;  %1859 = vmatpush.msra.mxu3 %v1231_v37  ;;  %v983_v62 = vadd.f32 %v2076_v0, %v982_v45  ;;  %v1025_v41 = vmul.f32 %v2080_v5, %v3149_v38  ;;  %vm986_vm2 = vmor %vm984_vm1, %vm985_vm15 }
 0x290   : > { %v1227_v24 = vadd.f32 %v3118_v18, %v1217_v10  ;;  %v1057_v53 = vmul.f32 %v3120_v40, %v1056_v35  ;;  %1263 = vst [vmem:[%s2455_s26 + $0x10] sm:$0xff] %v1255_v29  ;;  %v991_v19 = vor.u32 1.1754944e-38, %v990_v60  ;;  %v1229_v46 = vadd.f32 %v3118_v18, %v1219_v26 }
 0x291   : > { %v755_v4 = vsub.f32 0.0, %v3174_v54  ;;  %1375 = vmatpush.msrb.mxu0 %v1230_v25  ;;  %1860 = vmatpush.msra.mxu3 %v1230_v25  ;;  %v987_v22 = vsel %vm986_vm2, %v2076_v0, %v983_v62  ;;  %vm989_vm3 = vcmp.eq.f32.partialorder %v988_v1, 8.507059e+37  ;;  %v1026_v61 = vsub.f32 1.0, %v1025_v41 }
 0x292   : > { %v1228_v13 = vadd.f32 %v3118_v18, %v3144_v30  ;;  %vm1059_vm4 = vweird.f32 %v3025_v15  ;;  %v992_v10 = vsel %vm989_vm3, %v991_v19, %v987_v22  ;;  %v1035_v16 = vand.u32 2147483648, %v3149_v38 }
 0x293   : > { %v801_v36 = vmul.f32 1.442695, %v755_v4  ;;  %1376 = vmatpush.msrb.mxu0 %v1229_v46  ;;  %1861 = vmatpush.msra.mxu3 %v1229_v46  ;;  %v1199_v52 = vmul.f32 %v992_v10, %v3039_v32  ;;  %v1027_v35 = vmul.f32 %v2080_v5, %v1026_v61  ;;  %vm1030_vm5 = vweird.f32 %v2080_v5 }
 0x294   : > { %v2082_v55 = vpop.eup %2081  ;;  %v1033_v26 = vand.u32 2147483647, %v3149_v38  ;;  %v1058_v51 = vadd.f32 %v3120_v40, %v1057_v53  ;;  %vm1060_vm6 = vweird.f32 %v3120_v40  ;;  %vm1029_vm7 = vweird.f32 %v3149_v38 }
 0x295   : > { %v2084_v0 = vpop.eup %2083  ;;  %v3196_v30 = vadd.f32 1.0, %v2082_v55  ;;  %2085 = vpow2.f32 %v801_v36  ;;  %1377 = vmatpush.msrb.mxu0 %v1228_v13  ;;  %1862 = vmatpush.msra.mxu3 %v1228_v13  ;;  %v1256_v49 = vmul.f32 %v1199_v52, %v1198_v56  ;;  %v1028_v17 = vadd.f32 %v2080_v5, %v1027_v35  ;;  %vm1031_vm8 = vmor %vm1029_vm7, %vm1030_vm5 }
 0x296   : > { %v1070_v32 = vmul.f32 %v2084_v0, %v3171_v44  ;;  %v1063_v48 = vand.u32 2147483647, %v3025_v15  ;;  %v1065_v9 = vand.u32 2147483648, %v3025_v15  ;;  %v1036_v12 = vor.u32 1.1754944e-38, %v1035_v16  ;;  %vm3210_vm9 = vmor %vm1059_vm4, %vm1060_vm6 }
 0x297   : > { %2087 = vrcp.f32 %v3196_v30  ;;  %1378 = vmatpush.msrb.mxu0 %v1227_v24  ;;  %1863 = vmatpush.msra.mxu3 %v1227_v24  ;;  %v1201_v63 = vmul.f32 %v3011_v6, %v2808_v21  ;;  %1264 = vst [vmem:[%s2455_s26 + $0x18] sm:$0xff] %v1256_v49  ;;  %v1032_v2 = vsel %vm1031_vm8, %v2080_v5, %v1028_v17  ;;  %vm1034_vm10 = vcmp.eq.f32.partialorder %v1033_v26, 8.507059e+37 }
 0x298   : > { %v1071_v14 = vsub.f32 1.0, %v1070_v32  ;;  %v1062_v3 = vsel %vm3210_vm9, %v3120_v40, %v1058_v51  ;;  %v1037_v31 = vsel %vm1034_vm10, %v1036_v12, %v1032_v2  ;;  %v1080_v27 = vand.u32 2147483648, %v3171_v44 }
 0x299   : > { %1379 = vmatpush.msrb.mxu0 %v3132_v42  ;;  %1864 = vmatpush.msra.mxu3 %v3132_v42  ;;  %v1225_v21 = vadd.f32 %v3118_v18, %v3006_v58  ;;  %v1202_v6 = vmul.f32 %v1037_v31, %v3074_v59  ;;  %vm1075_vm11 = vweird.f32 %v2084_v0  ;;  %v1078_v37 = vand.u32 2147483647, %v3171_v44 }
 0x29a   : > { %v1072_v15 = vmul.f32 %v2084_v0, %v1071_v14  ;;  %vm1105_vm12 = vweird.f32 %v2844_v47  ;;  %v1110_v40 = vand.u32 2147483648, %v2830_v34  ;;  %vm1064_vm13 = vcmp.eq.f32.partialorder %v1063_v48, 8.507059e+37 }
 0x29b   : > { %v2086_v11 = vpop.eup %2085  ;;  %v1066_v1 = vor.u32 1.1754944e-38, %v1065_v9  ;;  %1380 = vmatpush.msrb.mxu0 %v1225_v21  ;;  %1865 = vmatpush.msra.mxu3 %v1225_v21  ;;  %v1257_v42 = vmul.f32 %v1202_v6, %v1201_v63  ;;  %vm1074_vm14 = vweird.f32 %v3171_v44  ;;  %v1103_v18 = vadd.f32 %v2844_v47, %v2976_v39 }
 0x29c   : > { %v1073_v60 = vadd.f32 %v2084_v0, %v1072_v15  ;;  %v3228_v58 = vadd.f32 1.0, %v2086_v11  ;;  %v1146_v33 = vsub.f32 1.0, %v2989_v43  ;;  %vm1076_vm15 = vmor %vm1074_vm14, %vm1075_vm11  ;;  %v1081_v5 = vor.u32 1.1754944e-38, %v1080_v27 }
 0x29d   : > { %v2088_v59 = vpop.eup %2087  ;;  %v1067_v45 = vsel %vm1064_vm13, %v1066_v1, %v1062_v3  ;;  %1265 = vst [vmem:[%s2455_s26 + $0x20] sm:$0xff] %v1257_v42  ;;  %vm1079_vm1 = vcmp.eq.f32.partialorder %v1078_v37, 8.507059e+37  ;;  %vm1104_vm2 = vweird.f32 %v2830_v34  ;;  %v1108_v44 = vand.u32 2147483647, %v2830_v34 }
 0x29e   : > { %v1077_v56 = vsel %vm1076_vm15, %v2084_v0, %v1073_v60  ;;  %v1115_v29 = vmul.f32 %v2088_v59, %v3196_v30  ;;  %2089 = vrcp.f32 %v3228_v58  ;;  %vm1106_vm3 = vmor %vm1104_vm2, %vm1105_vm12  ;;  %v1204_v39 = vmul.f32 %v1067_v45, %v2865_v23  ;;  %v1269_v60 = vld [vmem:[#allocation2 + $0x30] sm:$0xff] }
 0x29f   : > { %v1082_v25 = vsel %vm1079_vm1, %v1081_v5, %v1077_v56  ;;  %v1107_v41 = vsel %vm1106_vm3, %v2844_v47, %v1103_v18  ;;  %v1111_v24 = vor.u32 1.1754944e-38, %v1110_v40  ;;  %v1147_v53 = vmul.f32 %v2929_v7, %v1146_v33  ;;  %v1270_v18 = vld [vmem:[#allocation2] sm:$0xff]  ;;  %v1271_v5 = vld [vmem:[#allocation2 + $0x58] sm:$0xff] }
 0x2a0   : > { %v1205_v43 = vmul.f32 %v1082_v25, %v3112_v50  ;;  %v1116_v62 = vsub.f32 1.0, %v1115_v29  ;;  %v1125_v19 = vand.u32 2147483648, %v3196_v30  ;;  %vm1120_vm4 = vweird.f32 %v2088_v59 }
 0x2a1   : > { %v1123_v34 = vand.u32 2147483647, %v3196_v30  ;;  %vm1109_vm5 = vcmp.eq.f32.partialorder %v1108_v44, 8.507059e+37  ;;  %vm1119_vm6 = vweird.f32 %v3196_v30  ;;  %v1148_v50 = vadd.f32 %v2929_v7, %v1147_v53  ;;  %v1272_v44 = vld [vmem:[#allocation2 + $0x18] sm:$0xff] }
 0x2a2   : > { %v1258_v4 = vmul.f32 %v1205_v43, %v1204_v39  ;;  %v1117_v46 = vmul.f32 %v2088_v59, %v1116_v62  ;;  %v1112_v61 = vsel %vm1109_vm5, %v1111_v24, %v1107_v41  ;;  %vm1150_vm7 = vweird.f32 %v2929_v7  ;;  %vm1121_vm8 = vmor %vm1119_vm6, %vm1120_vm4  ;;  %v1273_v43 = vld [vmem:[#allocation2 + $0x50] sm:$0xff]  ;;  %v1274_v24 = vld [vmem:[#allocation2 + $0x68] sm:$0xff] }
 0x2a3   : > { %v1126_v47 = vor.u32 1.1754944e-38, %v1125_v19  ;;  %v1155_v10 = vand.u32 2147483648, %v2877_v28  ;;  %vm1124_vm9 = vcmp.eq.f32.partialorder %v1123_v34, 8.507059e+37  ;;  %vm1149_vm10 = vweird.f32 %v2877_v28 }
 0x2a4   : > { %v2090_v22 = vpop.eup %2089  ;;  %1266 = vst [vmem:[%s2455_s26 + $0x28] sm:$0xff] %v1258_v4  ;;  %v1118_v23 = vadd.f32 %v2088_v59, %v1117_v46  ;;  %v1153_v36 = vand.u32 2147483647, %v2877_v28  ;;  %v1207_v35 = vmul.f32 %v1112_v61, %v2803_v8  ;;  %vm1151_vm11 = vmor %vm1149_vm10, %vm1150_vm7  ;;  %v1170_v0 = vand.u32 2147483648, %v3228_v58  ;;  %v1275_v4 = vld [vmem:[#allocation2 + $0x8] sm:$0xff] }
 0x2a5   : > { %v1160_v13 = vmul.f32 %v2090_v22, %v3228_v58  ;;  %v1152_v51 = vsel %vm1151_vm11, %v2929_v7, %v1148_v50  ;;  %vm1165_vm12 = vweird.f32 %v2090_v22  ;;  %v1168_v49 = vand.u32 2147483647, %v3228_v58  ;;  %v1277_v50 = vld [vmem:[#allocation2 + $0x40] sm:$0xff] }
 0x2a6   : > { %v1122_v16 = vsel %vm1121_vm8, %v2088_v59, %v1118_v23  ;;  %v1156_v17 = vor.u32 1.1754944e-38, %v1155_v10  ;;  %vm1154_vm13 = vcmp.eq.f32.partialorder %v1153_v36, 8.507059e+37  ;;  %vm1164_vm14 = vweird.f32 %v3228_v58  ;;  %v1278_v10 = vld [vmem:[#allocation2 + $0x20] sm:$0xff] }
 0x2a7   : > { %v1127_v55 = vsel %vm1124_vm9, %v1126_v47, %v1122_v16  ;;  %v1161_v52 = vsub.f32 1.0, %v1160_v13  ;;  %vm1166_vm15 = vmor %vm1164_vm14, %vm1165_vm12  ;;  %v1171_v8 = vor.u32 1.1754944e-38, %v1170_v0  ;;  %vm1169_vm1 = vcmp.eq.f32.partialorder %v1168_v49, 8.507059e+37 }
 0x2a8   : > { %v1208_v26 = vmul.f32 %v1127_v55, %v3152_v57  ;;  %v1157_v48 = vsel %vm1154_vm13, %v1156_v17, %v1152_v51  ;;  %v1279_v55 = vld [vmem:[#allocation2 + $0x10] sm:$0xff] }
 0x2a9   : > { %v1162_v30 = vmul.f32 %v2090_v22, %v1161_v52  ;;  %v1210_v7 = vmul.f32 %v1157_v48, %v2820_v20 }
 0x2aa   : > { %v1259_v32 = vmul.f32 %v1208_v26, %v1207_v35  ;;  %v1280_v26 = vld [vmem:[#allocation2 + $0x38] sm:$0xff] }
 0x2ab   : > { %v1163_v28 = vadd.f32 %v2090_v22, %v1162_v30  ;;  %v1281_v30 = vld [vmem:[#allocation2 + $0x60] sm:$0xff] }
 0x2ac   : > { %1267 = vst [vmem:[%s2455_s26 + $0x30] sm:$0xff] %v1259_v32  ;;  %v1282_v32 = vld [vmem:[#allocation2 + $0x70] sm:$0xff] }
 0x2ad   : > { %v1167_v57 = vsel %vm1166_vm15, %v2090_v22, %v1163_v28  ;;  %v1276_v22 = vld [vmem:[#allocation2 + $0x48] sm:$0xff] }
 0x2ae   : > { %v1172_v9 = vsel %vm1169_vm1, %v1171_v8, %v1167_v57  ;;  %v1283_v8 = vld [vmem:[#allocation2 + $0x78] sm:$0xff] }
 0x2af   : > { %v1211_v12 = vmul.f32 %v1172_v9, %v3174_v54 }
 0x2b1   : > { %v1260_v63 = vmul.f32 %v1211_v12, %v1210_v7  ;;  %v1284_v7 = vld [vmem:[#allocation2 + $0x28] sm:$0xff] }
 0x2b3   : > { %1268 = vst [vmem:[%s2455_s26 + $0x38] sm:$0xff] %v1260_v63 }
 0x2fa   : > { %v1301_v38 = vpop.trf.xlu1 }
 0x2fb   : > { %1819 = vmatmul.msk.f32.vlgmr.msrb.gmra.mxu0 %vm346_vm0, %v1301_v38 }
 0x302   : > { %v1302_v2 = vpop.trf.xlu1 }
 0x303   : > { %1820 = vmatmul.msk.f32.gmra.mxu0 %vm346_vm0, %v1302_v2 }
 0x30a   : > { %v1303_v14 = vpop.trf.xlu1 }
 0x30b   : > { %1821 = vmatmul.msk.f32.gmra.mxu0 %vm346_vm0, %v1303_v14 }
 0x312   : > { %v1304_v3 = vpop.trf.xlu1 }
 0x313   : > { %1822 = vmatmul.msk.f32.gmra.mxu0 %vm346_vm0, %v1304_v3 }
 0x31a   : > { %v1305_v31 = vpop.trf.xlu1 }
 0x31b   : > { %1823 = vmatmul.msk.f32.gmra.mxu0 %vm346_vm0, %v1305_v31 }
 0x322   : > { %v1306_v20 = vpop.trf.xlu1 }
 0x323   : > { %1824 = vmatmul.msk.f32.gmra.mxu0 %vm346_vm0, %v1306_v20 }
 0x32a   : > { %v1307_v54 = vpop.trf.xlu1 }
 0x32b   : > { %1825 = vmatmul.msk.f32.vlgmr.msra.gmra.mxu3 %vm346_vm0, %v1307_v54 }
 0x332   : > { %v1308_v27 = vpop.trf.xlu1 }
 0x333   : > { %1826 = vmatmul.msk.f32.gmra.mxu3 %vm346_vm0, %v1308_v27 }
 0x33a   : > { %v1309_v21 = vpop.trf.xlu1 }
 0x33b   : > { %1827 = vmatmul.msk.f32.gmra.mxu3 %vm346_vm0, %v1309_v21 }
 0x342   : > { %v1310_v6 = vpop.trf.xlu1 }
 0x343   : > { %1828 = vmatmul.msk.f32.gmra.mxu3 %vm346_vm0, %v1310_v6 }
 0x34a   : > { %v1311_v15 = vpop.trf.xlu1 }
 0x34b   : > { %1829 = vmatmul.msk.f32.gmra.mxu3 %vm346_vm0, %v1311_v15 }
 0x352   : > { %v1312_v37 = vpop.trf.xlu1 }
 0x353   : > { %1830 = vmatmul.msk.f32.gmra.mxu3 %vm346_vm0, %v1312_v37 }
 0x35a   : > { %v1313_v11 = vpop.trf.xlu1 }
 0x35b   : > { %1831 = vmatmul.msk.f32.gmra.mxu3 %vm346_vm0, %v1313_v11 }
 0x362   : > { %v1314_v40 = vpop.trf.xlu1 }
 0x363   : > { %1832 = vmatmul.msk.f32.gmra.mxu3 %vm346_vm0, %v1314_v40 }
 0x36a   : > { %v1315_v1 = vpop.trf.xlu1 }
 0x36b   : > { %1833 = vmatmul.msk.f32.gmra.mxu3 %vm346_vm0, %v1315_v1 }
 0x372   : > { %v1316_v42 = vpop.trf.xlu1 }
 0x373   : > { %1834 = vmatmul.msk.f32.gmra.mxu3 %vm346_vm0, %v1316_v42 }
 0x378   : > { %v1382_v58 = vpop.f32.mrf.mxu0 }
 0x379   : > { %v1430_v59 = vadd.f32 %v1382_v58, %v1269_v60 }
 0x37b   : > { %1446 = vst [vmem:[#allocation2 + $0x30] sm:$0xff] %v1430_v59 }
 0x380   : > { %v1385_v33 = vpop.f32.mrf.mxu0 }
 0x381   : > { %v1431_v45 = vadd.f32 %v1385_v33, %v1270_v18 }
 0x383   : > { %1447 = vst [vmem:[#allocation2] sm:$0xff] %v1431_v45 }
 0x388   : > { %v1388_v56 = vpop.f32.mrf.mxu0 }
 0x389   : > { %v1432_v29 = vadd.f32 %v1388_v56, %v1271_v5 }
 0x38b   : > { %1448 = vst [vmem:[#allocation2 + $0x58] sm:$0xff] %v1432_v29 }
 0x390   : > { %v1391_v25 = vpop.f32.mrf.mxu0 }
 0x391   : > { %v1433_v39 = vadd.f32 %v1391_v25, %v1272_v44 }
 0x393   : > { %1449 = vst [vmem:[#allocation2 + $0x18] sm:$0xff] %v1433_v39 }
 0x398   : > { %v1394_v62 = vpop.f32.mrf.mxu0 }
 0x399   : > { %v1434_v41 = vadd.f32 %v1394_v62, %v1273_v43 }
 0x39b   : > { %1450 = vst [vmem:[#allocation2 + $0x50] sm:$0xff] %v1434_v41 }
 0x3a0   : > { %v1397_v53 = vpop.f32.mrf.mxu0 }
 0x3a1   : > { %v1435_v19 = vadd.f32 %v1397_v53, %v1274_v24 }
 0x3a3   : > { %1451 = vst [vmem:[#allocation2 + $0x68] sm:$0xff] %v1435_v19 }
 0x3ae   : > { %v1400_v46 = vpop.f32.mrf.mxu3 }
 0x3af   : > { %v1436_v34 = vadd.f32 %v1400_v46, %v1275_v4 }
 0x3b1   : > { %1452 = vst [vmem:[#allocation2 + $0x8] sm:$0xff] %v1436_v34 }
 0x3b6   : > { %v1403_v61 = vpop.f32.mrf.mxu3 }
 0x3b7   : > { %v1437_v23 = vadd.f32 %v1403_v61, %v1276_v22 }
 0x3b9   : > { %1453 = vst [vmem:[#allocation2 + $0x48] sm:$0xff] %v1437_v23 }
 0x3be   : > { %v1406_v47 = vpop.f32.mrf.mxu3 }
 0x3bf   : > { %v1438_v13 = vadd.f32 %v1406_v47, %v1277_v50 }
 0x3c1   : > { %1454 = vst [vmem:[#allocation2 + $0x40] sm:$0xff] %v1438_v13 }
 0x3c6   : > { %v1409_v16 = vpop.f32.mrf.mxu3 }
 0x3c7   : > { %v1439_v36 = vadd.f32 %v1409_v16, %v1278_v10 }
 0x3c9   : > { %1455 = vst [vmem:[#allocation2 + $0x20] sm:$0xff] %v1439_v36 }
 0x3ce   : > { %v1412_v52 = vpop.f32.mrf.mxu3 }
 0x3cf   : > { %v1440_v35 = vadd.f32 %v1412_v52, %v1279_v55 }
 0x3d1   : > { %1456 = vst [vmem:[#allocation2 + $0x10] sm:$0xff] %v1440_v35 }
 0x3d6   : > { %v1415_v0 = vpop.f32.mrf.mxu3 }
 0x3d7   : > { %v1441_v51 = vadd.f32 %v1415_v0, %v1280_v26 }
 0x3d9   : > { %1457 = vst [vmem:[#allocation2 + $0x38] sm:$0xff] %v1441_v51 }
 0x3de   : > { %v1418_v49 = vpop.f32.mrf.mxu3 }
 0x3df   : > { %v1442_v17 = vadd.f32 %v1418_v49, %v1281_v30 }
 0x3e1   : > { %1458 = vst [vmem:[#allocation2 + $0x60] sm:$0xff] %v1442_v17 }
 0x3e6   : > { %v1421_v28 = vpop.f32.mrf.mxu3 }
 0x3e7   : > { %v1443_v48 = vadd.f32 %v1421_v28, %v1282_v32 }
 0x3e9   : > { %1459 = vst [vmem:[#allocation2 + $0x70] sm:$0xff] %v1443_v48 }
 0x3ee   : > { %v1424_v57 = vpop.f32.mrf.mxu3 }
 0x3ef   : > { %v1444_v9 = vadd.f32 %v1424_v57, %v1283_v8 }
 0x3f1   : > { %1460 = vst [vmem:[#allocation2 + $0x78] sm:$0xff] %v1444_v9 }
 0x3f5   : > { %1465 = sbr.rel (%p1835_p8) target bundleno = 1162 (0x48a), region = 52 }
 0x3f6   : > { %v1427_v12 = vpop.f32.mrf.mxu3 }
 0x3f7   : > { %v1445_v63 = vadd.f32 %v1427_v12, %v1284_v7 }
 0x3f9   : > { %1461 = vst [vmem:[#allocation2 + $0x28] sm:$0xff] %v1445_v63 }
 0x3fa   : > { %v1466_v38 = vld [vmem:[#allocation2 + $0x30] sm:$0xff]  ;;  %v1467_v2 = vld [vmem:[#allocation2] sm:$0xff]  ;;  %v1468_v14 = vld [vmem:[#allocation2 + $0x58] sm:$0xff] }
 0x3fb   : > { %v1469_v3 = vld [vmem:[#allocation2 + $0x18] sm:$0xff]  ;;  %v1470_v31 = vld [vmem:[#allocation2 + $0x50] sm:$0xff]  ;;  %v1471_v20 = vld [vmem:[#allocation2 + $0x68] sm:$0xff]  ;;  %v1482_v54 = vmul.f32 0.0078125, %v1466_v38  ;;  %v1483_v27 = vmul.f32 0.0078125, %v1467_v2  ;;  %v1484_v21 = vmul.f32 0.0078125, %v1468_v14 }
 0x3fc   : > { %v1472_v6 = vld [vmem:[#allocation2 + $0x8] sm:$0xff]  ;;  %v1474_v37 = vld [vmem:[#allocation2 + $0x40] sm:$0xff]  ;;  %v1485_v11 = vmul.f32 0.0078125, %v1469_v3  ;;  %v1486_v40 = vmul.f32 0.0078125, %v1470_v31  ;;  %v1487_v1 = vmul.f32 0.0078125, %v1471_v20  ;;  %v1476_v60 = vld [vmem:[#allocation2 + $0x10] sm:$0xff] }
 0x3fd   : > { %v1473_v15 = vld [vmem:[#allocation2 + $0x48] sm:$0xff]  ;;  %v1475_v42 = vld [vmem:[#allocation2 + $0x20] sm:$0xff]  ;;  %v1477_v58 = vld [vmem:[#allocation2 + $0x38] sm:$0xff]  ;;  %v1488_v59 = vmul.f32 0.0078125, %v1472_v6  ;;  %v3282_v33 = vmul.f32 0.0078125, %v1474_v37  ;;  %v3286_v44 = vmul.f32 0.0078125, %v1476_v60 }
 0x3fe   : > { %v1489_v18 = vmul.f32 0.0078125, %v1473_v15  ;;  %v1478_v45 = vld [vmem:[#allocation2 + $0x60] sm:$0xff]  ;;  %v1479_v5 = vld [vmem:[#allocation2 + $0x70] sm:$0xff]  ;;  %v1480_v56 = vld [vmem:[#allocation2 + $0x78] sm:$0xff]  ;;  %v3284_v29 = vmul.f32 0.0078125, %v1475_v42  ;;  %v3288_v25 = vmul.f32 0.0078125, %v1477_v58  ;;  %v1498_v39 = vmax.f32 %v1482_v54, %v1486_v40 }
 0x3ff   : > { %v3290_v62 = vmul.f32 0.0078125, %v1478_v45  ;;  %v3292_v41 = vmul.f32 0.0078125, %v1479_v5  ;;  %v3294_v24 = vmul.f32 0.0078125, %v1480_v56  ;;  %v1499_v53 = vmax.f32 %v1483_v27, %v1487_v1 }
 0x400   : > { %v1481_v43 = vld [vmem:[#allocation2 + $0x28] sm:$0xff]  ;;  %v1500_v4 = vmax.f32 %v1484_v21, %v1488_v59  ;;  %v1501_v46 = vmax.f32 %v1485_v11, %v1489_v18  ;;  %v1502_v34 = vmax.f32 %v1498_v39, %v3282_v33 }
 0x401   : > { %v3296_v19 = vmul.f32 0.0078125, %v1481_v43  ;;  %v1503_v22 = vmax.f32 %v1499_v53, %v3284_v29 }
 0x402   : > { %v1504_v61 = vmax.f32 %v1500_v4, %v3286_v44  ;;  %v1505_v23 = vmax.f32 %v1501_v46, %v3288_v25  ;;  %v1506_v50 = vmax.f32 %v1502_v34, %v3290_v62 }
 0x403   : > { %v1507_v47 = vmax.f32 %v1503_v22, %v3292_v41 }
 0x404   : > { %v1508_v13 = vmax.f32 %v1504_v61, %v3294_v24  ;;  %v1509_v10 = vmax.f32 %v1505_v23, %v3296_v19 }
 0x405   : > { %v1510_v16 = vmax.f32 %v1506_v50, %v1507_v47 }
 0x406   : > { %v1511_v36 = vmax.f32 %v1508_v13, %v1509_v10 }
 0x408   : > { %v1512_v55 = vmax.f32 %v1510_v16, %v1511_v36 }
 0x40a   : > { %v1513_v52 = vrot.slane %v1512_v55, 4 }
 0x40c   : > { %v1514_v35 = vmax.f32 %v1512_v55, %v1513_v52 }
 0x40e   : > { %v1515_v26 = vrot.slane %v1514_v35, 2 }
 0x410   : > { %v1516_v0 = vmax.f32 %v1514_v35, %v1515_v26 }
 0x412   : > { %v1517_v51 = vrot.slane %v1516_v0, 1 }
 0x414   : > { %v3306_v30 = vmax.f32 %v1516_v0, %v1517_v51 }
 0x416   : > { %v1519_v49 = vsub.f32 %v1482_v54, %v3306_v30  ;;  %v1520_v17 = vsub.f32 %v1483_v27, %v3306_v30  ;;  %v1521_v32 = vsub.f32 %v1484_v21, %v3306_v30  ;;  %v1522_v28 = vsub.f32 %v1485_v11, %v3306_v30 }
 0x417   : > { %v1523_v48 = vsub.f32 %v1486_v40, %v3306_v30  ;;  %v1524_v7 = vsub.f32 %v1487_v1, %v3306_v30  ;;  %v1525_v63 = vsub.f32 %v1488_v59, %v3306_v30  ;;  %v1526_v2 = vsub.f32 %v1489_v18, %v3306_v30 }
 0x418   : > { %v1535_v8 = vmul.f32 1.442695, %v1519_v49  ;;  %v1537_v57 = vmul.f32 1.442695, %v1520_v17  ;;  %v1539_v9 = vmul.f32 1.442695, %v1521_v32  ;;  %v1527_v3 = vsub.f32 %v3282_v33, %v3306_v30 }
 0x419   : > { %v1541_v12 = vmul.f32 1.442695, %v1522_v28  ;;  %v1543_v38 = vmul.f32 1.442695, %v1523_v48  ;;  %v1545_v14 = vmul.f32 1.442695, %v1524_v7  ;;  %v1528_v27 = vsub.f32 %v3284_v29, %v3306_v30 }
 0x41a   : > { %2091 = vpow2.f32 %v1535_v8  ;;  %v1547_v31 = vmul.f32 1.442695, %v1525_v63  ;;  %v1549_v21 = vmul.f32 1.442695, %v1526_v2  ;;  %v1529_v11 = vsub.f32 %v3286_v44, %v3306_v30 }
 0x41b   : > { %2093 = vpow2.f32 %v1537_v57  ;;  %v1551_v40 = vmul.f32 1.442695, %v1527_v3  ;;  %v1530_v60 = vsub.f32 %v3288_v25, %v3306_v30  ;;  %v1553_v58 = vmul.f32 1.442695, %v1528_v27 }
 0x41c   : > { %2095 = vpow2.f32 %v1539_v9  ;;  %v1531_v33 = vsub.f32 %v3290_v62, %v3306_v30  ;;  %v1555_v45 = vmul.f32 1.442695, %v1529_v11  ;;  %v1532_v29 = vsub.f32 %v3292_v41, %v3306_v30 }
 0x41d   : > { %2097 = vpow2.f32 %v1541_v12  ;;  %v1557_v44 = vmul.f32 1.442695, %v1530_v60  ;;  %v1533_v43 = vsub.f32 %v3294_v24, %v3306_v30  ;;  %v1534_v46 = vsub.f32 %v3296_v19, %v3306_v30 }
 0x41e   : > { %2099 = vpow2.f32 %v1543_v38  ;;  %v1559_v62 = vmul.f32 1.442695, %v1531_v33  ;;  %v1561_v34 = vmul.f32 1.442695, %v1532_v29 }
 0x41f   : > { %2101 = vpow2.f32 %v1545_v14  ;;  %v1563_v61 = vmul.f32 1.442695, %v1533_v43  ;;  %v1565_v47 = vmul.f32 1.442695, %v1534_v46 }
 0x420   : > { %v3318_v20 = vpop.eup %2091  ;;  %2103 = vpow2.f32 %v1547_v31 }
 0x421   : > { %v3320_v54 = vpop.eup %2093  ;;  %2105 = vpow2.f32 %v1549_v21 }
 0x422   : > { %v3324_v6 = vpop.eup %2095  ;;  %v1567_v15 = vadd.f32 %v3320_v54, %v3318_v20  ;;  %2107 = vpow2.f32 %v1551_v40 }
 0x423   : > { %v3328_v37 = vpop.eup %2097  ;;  %2109 = vpow2.f32 %v1553_v58 }
 0x424   : > { %v1568_v1 = vadd.f32 %v3324_v6, %v1567_v15  ;;  %v3333_v42 = vpop.eup %2099  ;;  %2111 = vpow2.f32 %v1555_v45 }
 0x425   : > { %v3338_v18 = vpop.eup %2101  ;;  %2113 = vpow2.f32 %v1557_v44 }
 0x426   : > { %v1569_v59 = vadd.f32 %v3328_v37, %v1568_v1  ;;  %v3343_v56 = vpop.eup %2103  ;;  %2115 = vpow2.f32 %v1559_v62 }
 0x427   : > { %v3348_v39 = vpop.eup %2105  ;;  %2117 = vpow2.f32 %v1561_v34 }
 0x428   : > { %v1570_v5 = vadd.f32 %v3333_v42, %v1569_v59  ;;  %v2108_v4 = vpop.eup %2107  ;;  %2119 = vpow2.f32 %v1563_v61 }
 0x429   : > { %v2110_v22 = vpop.eup %2109  ;;  %2121 = vpow2.f32 %v1565_v47 }
 0x42a   : > { %v1571_v25 = vadd.f32 %v3338_v18, %v1570_v5  ;;  %v2112_v50 = vpop.eup %2111 }
 0x42b   : > { %v2114_v13 = vpop.eup %2113 }
 0x42c   : > { %v1572_v53 = vadd.f32 %v3343_v56, %v1571_v25  ;;  %v2116_v16 = vpop.eup %2115 }
 0x42d   : > { %v2118_v55 = vpop.eup %2117 }
 0x42e   : > { %v1573_v41 = vadd.f32 %v3348_v39, %v1572_v53  ;;  %v2120_v52 = vpop.eup %2119 }
 0x42f   : > { %v2122_v26 = vpop.eup %2121 }
 0x430   : > { %v1574_v23 = vadd.f32 %v2108_v4, %v1573_v41 }
 0x432   : > { %v1575_v24 = vadd.f32 %v2110_v22, %v1574_v23 }
 0x434   : > { %v1576_v10 = vadd.f32 %v2112_v50, %v1575_v24 }
 0x436   : > { %v1577_v36 = vadd.f32 %v2114_v13, %v1576_v10 }
 0x438   : > { %v1578_v19 = vadd.f32 %v2116_v16, %v1577_v36 }
 0x43a   : > { %v1579_v35 = vadd.f32 %v2118_v55, %v1578_v19 }
 0x43c   : > { %v1580_v0 = vadd.f32 %v2120_v52, %v1579_v35 }
 0x43e   : > { %v1581_v51 = vadd.f32 %v2122_v26, %v1580_v0 }
 0x440   : > { %v1582_v30 = vrot.slane %v1581_v51, 4 }
 0x442   : > { %v1583_v49 = vadd.f32 %v1582_v30, %v1581_v51 }
 0x444   : > { %v1584_v17 = vrot.slane %v1583_v49, 2 }
 0x446   : > { %v1585_v32 = vadd.f32 %v1584_v17, %v1583_v49 }
 0x448   : > { %v1586_v28 = vrot.slane %v1585_v32, 1 }
 0x44a   : > { %v1587_v48 = vadd.f32 %v1586_v28, %v1585_v32 }
 0x44c   : > { %2123 = vrcp.f32 %v1587_v48  ;;  %v1599_v9 = vand.u32 2147483648, %v1587_v48  ;;  %vm1593_vm0 = vweird.f32 %v1587_v48  ;;  %v1597_v12 = vand.u32 2147483647, %v1587_v48 }
 0x44e   : > { %v1600_v38 = vor.u32 1.1754944e-38, %v1599_v9  ;;  %vm1598_vm4 = vcmp.eq.f32.partialorder %v1597_v12, 8.507059e+37 }
 0x452   : > { %v2124_v8 = vpop.eup %2123 }
 0x453   : > { %v1589_v57 = vmul.f32 %v2124_v8, %v1587_v48  ;;  %vm1594_vm2 = vweird.f32 %v2124_v8 }
 0x454   : > { %vm1595_vm3 = vmor %vm1593_vm0, %vm1594_vm2 }
 0x455   : > { %v1590_v7 = vsub.f32 1.0, %v1589_v57 }
 0x457   : > { %v1591_v63 = vmul.f32 %v2124_v8, %v1590_v7 }
 0x459   : > { %v1592_v2 = vadd.f32 %v2124_v8, %v1591_v63 }
 0x45b   : > { %v1596_v14 = vsel %vm1595_vm3, %v2124_v8, %v1592_v2 }
 0x45c   : > { %v1601_v3 = vsel %vm1598_vm4, %v1600_v38, %v1596_v14 }
 0x45d   : > { %v1602_v31 = vmul.f32 %v3318_v20, %v1601_v3  ;;  %v1603_v27 = vmul.f32 %v3320_v54, %v1601_v3  ;;  %v1604_v21 = vmul.f32 %v3324_v6, %v1601_v3  ;;  %v1605_v15 = vmul.f32 %v3328_v37, %v1601_v3 }
 0x45e   : > { %v1606_v40 = vmul.f32 %v3333_v42, %v1601_v3  ;;  %v1607_v60 = vmul.f32 %v3338_v18, %v1601_v3  ;;  %v1608_v59 = vmul.f32 %v3343_v56, %v1601_v3  ;;  %v1609_v45 = vmul.f32 %v3348_v39, %v1601_v3 }
 0x45f   : > { %v1618_v11 = vadd.f32 %v1603_v27, %v1602_v31  ;;  %v1610_v20 = vmul.f32 %v2108_v4, %v1601_v3  ;;  %v1611_v54 = vmul.f32 %v2110_v22, %v1601_v3  ;;  %v1612_v6 = vmul.f32 %v2112_v50, %v1601_v3 }
 0x460   : > { %v1613_v37 = vmul.f32 %v2114_v13, %v1601_v3  ;;  %v1614_v62 = vmul.f32 %v2116_v16, %v1601_v3  ;;  %v1615_v53 = vmul.f32 %v2118_v55, %v1601_v3  ;;  %v1616_v46 = vmul.f32 %v2120_v52, %v1601_v3 }
 0x461   : > { %v1619_v1 = vadd.f32 %v1618_v11, %v1604_v21  ;;  %v1617_v56 = vmul.f32 %v2122_v26, %v1601_v3 }
 0x463   : > { %v1620_v58 = vadd.f32 %v1619_v1, %v1605_v15 }
 0x465   : > { %v1621_v33 = vadd.f32 %v1620_v58, %v1606_v40 }
 0x467   : > { %v1622_v5 = vadd.f32 %v1621_v33, %v1607_v60 }
 0x469   : > { %v1623_v29 = vadd.f32 %v1622_v5, %v1608_v59 }
 0x46b   : > { %v1624_v44 = vadd.f32 %v1623_v29, %v1609_v45 }
 0x46d   : > { %v1625_v25 = vadd.f32 %v1624_v44, %v1610_v20 }
 0x46f   : > { %v1626_v43 = vadd.f32 %v1625_v25, %v1611_v54 }
 0x471   : > { %v1627_v42 = vadd.f32 %v1626_v43, %v1612_v6 }
 0x473   : > { %v1628_v18 = vadd.f32 %v1627_v42, %v1613_v37 }
 0x475   : > { %v1629_v34 = vadd.f32 %v1628_v18, %v1614_v62 }
 0x477   : > { %v1630_v41 = vadd.f32 %v1629_v34, %v1615_v53 }
 0x479   : > { %v1631_v61 = vadd.f32 %v1630_v41, %v1616_v46 }
 0x47b   : > { %v1632_v39 = vadd.f32 %v1631_v61, %v1617_v56 }
 0x47d   : > { %v1633_v23 = vrot.slane %v1632_v39, 4 }
 0x47f   : > { %v1634_v4 = vadd.f32 %v1633_v23, %v1632_v39 }
 0x481   : > { %v1635_v47 = vrot.slane %v1634_v4, 2 }
 0x483   : > { %v1636_v22 = vadd.f32 %v1635_v47, %v1634_v4 }
 0x485   : > { %v1637_v24 = vrot.slane %v1636_v22, 1 }
 0x487   : > { %v1638_v50 = vadd.f32 %v1637_v24, %v1636_v22 }
 0x489   : > { %1639 = vst [vmem:[%s2459_s17] sm:$0x1] %v1638_v50 }
 0x48a PF: > { %s1838_s30 = sshll.u32 %s2263_s8, 4  ;;  %s1659_s21 = sshll.u32 %s2455_s26, 4  ;;  %s1660_s21 = int_to_ptr.vmem [resolvable:$true] %s1659_s21 }
 0x48b   : > { %s1656_s18 = sadd.s32 %s1838_s30, %s2444_s20  ;;  %s3502_s14 = sand.u32 1, %s2251_s28  }
 0x48c   : > { %s1839_s23 = sshll.u32 %s1656_s18, 3  ;;  %s1641_s15 = scalar_lea.sflag [#allocation4], %s3502_s14 }
 0x48d   : > { %s1658_s9 = scalar_lea.hbm %s3446_s6, %s1839_s23  ;;  %s2145_s26 = scalar_lea.hbm %s3446_s6, 256 }
 0x48e   : > { %s1661_s10 = sshll.u32 %s1658_s9, 4  ;;  %s1662_s10 = int_to_ptr.hbm [resolvable:$true] %s1661_s10 }
 0x48f   : > { %s2139_s16 = sshra.s32 %s1662_s10, 4  ;;  %s2140_s16 = int_to_ptr.hbm [resolvable:$true] %s2139_s16 }
 0x490   : > { %s2141_s0 = scalar_lea.hbm %s2140_s16, 64  ;;  %p2146_p0 = scmp.lt.s32.totalorder %s2140_s16, %s3446_s6 }
 0x491   : > { %p2142_p9 = scmp.ne.s32.totalorder %s2140_s16, %s2141_s0  ;;  %p2147_p1 = scmp.lt.s32.totalorder %s2145_s26, %s2141_s0 }
 0x493   : > { %p2143_p10 = pnand %p2142_p9, %p2394_p3  ;;  %p2148_p4 = por %p2147_p1, %p2146_p0 }
 0x495   : > { %p2144_p11 = pneg %p2143_p10 }
 0x497   : > { %p2149_p2 = pnand %p2148_p4, %p2144_p11 }
 0x499   : > { %2152 = shalt.err (!%p2149_p2)
}
 0x49a   : > { %s2279_s23 = smov 128   ;;  %s2280_s12 = smov 8  }
 0x49b   : > { %1866 = dma.vmem_to_hbm [thread:$0]  (%p2394_p3), %s1660_s21, 1024, %s1662_s10, %s1641_s15, %s2279_s23, %s2279_s23, %s2280_s12  }
 0x49c   : > { %s1673_s9 = scalar_lea.hbm %s3447_s7, %s2263_s8  ;;  %s1675_s14 = sshll.u32 %s2459_s17, 4  ;;  %s1676_s14 = int_to_ptr.vmem [resolvable:$true] %s1675_s14 }
 0x49d   : > { %s1677_s16 = sshll.u32 %s1673_s9, 4  ;;  %s3503_s0 = sand.u32 1, %s2239_s25   ;;  %s1678_s16 = int_to_ptr.hbm [resolvable:$true] %s1677_s16 }
 0x49e   : > { %s1646_s20 = scalar_lea.sflag [#allocation6], %s3503_s0  ;;  %s2167_s26 = sshra.s32 %s1678_s16, 4  ;;  %s2168_s26 = int_to_ptr.hbm [resolvable:$true] %s2167_s26 }
 0x49f   : > { %s2169_s30 = scalar_lea.hbm %s2168_s26, 1  ;;  %s2173_s21 = scalar_lea.hbm %s3447_s7, 2 }
 0x4a0   : > { %p2170_p5 = scmp.ne.s32.totalorder %s2168_s26, %s2169_s30  ;;  %p2174_p3 = scmp.lt.s32.totalorder %s2168_s26, %s3447_s7 }
 0x4a1   : > { %p2175_p9 = scmp.lt.s32.totalorder %s2173_s21, %s2169_s30 }
 0x4a2   : > { %p2171_p6 = pnand %p2170_p5, %p2421_p12 }
 0x4a3   : > { %p2176_p10 = por %p2175_p9, %p2174_p3 }
 0x4a4   : > { %p2172_p8 = pneg %p2171_p6 }
 0x4a6   : > { %p2177_p11 = pnand %p2176_p10, %p2172_p8 }
 0x4a8   : > { %2180 = shalt.err (!%p2177_p11)
}
 0x4a9   : > { %1867 = dma.vmem_to_hbm [thread:$0]  (%p2421_p12), %s1676_s14, 16, %s1678_s16, %s1646_s20  }
 0x4aa PF: > { %s3504_s8 = sld [smem:[#allocation10_spill]]  ;;  %p1877_p0 = scmp.ge.s32.totalorder %s2275_s11, 2 }
 0x4ac   : > { %p1871_p1 = pnand %p1877_p0, %p2409_p7 }
 0x4ae   : > { %p1872_p4 = pneg %p1871_p1 }
 0x4b0   : > { %s1689_s17 = sand.u32 1, %s3504_s8  }
 0x4b1   : > { %s1690_s23 = scalar_lea.sflag [#allocation4], %s1689_s17 }
 0x4b2   : > { %2226 = dma.done.wait (%p1872_p4), %s1690_s23, 1024  }
 0x4b3   : > { %2228 = vsyncadd (%p1872_p4), %s1690_s23, 4294966272  ;;  %s1699_s12 = sand.u32 1, %s2235_s24   ;;  %p1874_p2 = pnand %p1877_p0, %p2433_p13 }
 0x4b4   : > { %s1700_s13 = scalar_lea.sflag [#allocation6], %s1699_s12 }
 0x4b5   : > { %p1875_p5 = pneg %p1874_p2 }
 0x4b7   : > { %2230 = dma.done.wait (%p1875_p5), %s1700_s13, 16  }
 0x4b8   : > { %2232 = vsyncadd (%p1875_p5), %s1700_s13, 4294967280  ;;  %s24_s11 = sadd.s32 1, %s2275_s11   ;;  %s3505_s29 = sld [smem:[#allocation9_spill]] }
 0x4b9   : > { %p21_p12 = scmp.ge.s32.totalorder %s24_s11, 6   ;;  %s3506_s26 = sld [smem:[#allocation16_spill]] }
 0x4ba   : > { %s3507_s22 = sld [smem:[#allocation11_spill]]  ;;  %s3513_s24 = smov %s2239_s25 }
 0x4bb   : > { %s3508_s1 = sld [smem:[#allocation17_spill]]  ;;  %s3515_s27 = smov %s2251_s28 }
 0x4bc   : > { %s3509_s30 = sld [smem:[#allocation12_spill]] }
 0x4bd   : > { %s3510_s8 = sld [smem:[#allocation13_spill]]  ;;  %23 = sbr.rel (!%p21_p12) target bundleno = 12 (0xc), region = 104 }
 0x4be   : > { %s3511_s9 = sld [smem:[#allocation14_spill]]  ;;  %s3514_s25 = smov %s3505_s29 }
 0x4bf   : > { %s3512_s10 = sld [smem:[#allocation15_spill]] }
 0x4c0   : > { %s3516_s28 = smov %s3507_s22 }
 0x4c1   : > { %s3517_s29 = smov %s3508_s1 }
 0x4c2   :  { %1705 = vsyncpa [#allocation4], 1 }
 0x4c3   :  { %1707 = vsyncpa [#allocation4 + $0x1], 1 }
 0x4c4   :  { %1708 = vsyncpa [#allocation6], 1 }
 0x4c5   :  { %1710 = vsyncpa [#allocation6 + $0x1], 1 }

</bundles_post_ra>
